<compile_context>
chip_gen: v7x
topology: tpu7x:2x2x1
jax: 0.10.0
libtpu: 0.0.40
codegen_flags: <defaults>
</compile_context>

<pallas_src>
import jax
import jax.numpy as jnp
from jax import lax
from jax.experimental import pallas as pl
from jax.experimental.pallas import tpu as pltpu

EXPANSION = 4
BN_EPS = 1e-5


def _out_size(h, stride):
    # 3x3 conv, padding 1: floor((h + 2 - 3)/stride) + 1
    return (h - 1) // stride + 1


def _make_bottleneck_kernel(H, W, Cin, P, Cout, stride, TH, has_proj):
    """Kernel body for one (batch image, output-row tile) grid step."""
    s = stride
    Ho, Wo = _out_size(H, s), _out_size(W, s)
    halo = 2 // s                  # extra parity-space rows/cols for the 3x3 halo
    Wpar = Wo + halo               # parity-space width (not tiled)
    Rs = TH + halo                 # parity-space rows needed per output-row tile
    q1, rm1 = divmod(1, s)         # where padded coordinate "+1" lands in parity space
    f32 = jnp.float32

    def kernel(*refs):
        x_refs = refs[:s * s]
        w1_ref, b1_ref, w2_ref, b2_ref, w3_ref, b3_ref = refs[s * s:s * s + 6]
        rest = refs[s * s + 6:]
        if has_proj:
            wsc_ref, bsc_ref, o_ref = rest
        else:
            (o_ref,) = rest

        r = pl.program_id(1)
        row0 = pl.multiple_of(r * TH, TH)   # parity-space row offset of this tile

        # padded-image coordinates of every slab element (for halo masking)
        row_idx = lax.broadcasted_iota(jnp.int32, (Rs, Wpar, P), 0)
        col_idx = lax.broadcasted_iota(jnp.int32, (Rs, Wpar, P), 1)
        prow = s * (row0 + row_idx)
        pcol = s * col_idx

        w1 = w1_ref[...]
        b1 = b1_ref[...]

        # ---- conv1 (1x1, BN-folded) + relu, per spatial parity ---------------
        # Halo positions (the 3x3 conv's zero padding + alignment padding) are
        # masked to zero, so no padded scratch buffer / full zero-fill is used.
        x_slab = {}
        h1 = {}
        for py in range(s):
            for px in range(s):
                xs = x_refs[py * s + px][0, pl.ds(row0, Rs), :, :]  # (Rs, Wpar, Cin)
                x_slab[(py, px)] = xs
                h = jnp.dot(xs.reshape(Rs * Wpar, Cin), w1,
                            preferred_element_type=f32)
                h = jnp.maximum(h + b1, 0.0).reshape(Rs, Wpar, P)
                valid = ((prow + py >= 1) & (prow + py <= H)
                         & (pcol + px >= 1) & (pcol + px <= W))
                h1[(py, px)] = jnp.where(valid, h, 0.0)

        # ---- conv2 (3x3, stride) as one wide im2col matmul (K = 9*P) ---------
        # NOTE: taps with a sublane shift could additionally use pltpu.roll to
        # avoid relayout copies; left as a further micro-optimization.
        taps = []
        for ky in range(3):
            qy, py = divmod(ky, s)
            for kx in range(3):
                qx, px = divmod(kx, s)
                win = h1[(py, px)][qy:qy + TH, qx:qx + Wo, :]       # (TH, Wo, P)
                taps.append(win.reshape(TH * Wo, P))
        patches = jnp.concatenate(taps, axis=1)                     # (TH*Wo, 9P)
        h2 = jnp.dot(patches, w2_ref[...], preferred_element_type=f32)
        h2 = jnp.maximum(h2 + b2_ref[...], 0.0)

        # ---- conv3 (1x1, BN-folded) -------------------------------------------
        h3 = jnp.dot(h2, w3_ref[...], preferred_element_type=f32) + b3_ref[...]

        # ---- shortcut -----------------------------------------------------------
        xsc = x_slab[(rm1, rm1)][q1:q1 + TH, q1:q1 + Wo, :].reshape(TH * Wo, Cin)
        if has_proj:
            sc = jnp.dot(xsc, wsc_ref[...], preferred_element_type=f32) + bsc_ref[...]
        else:
            sc = xsc            # identity shortcut: no MXU/VPU pass at all

        out = jnp.maximum(h3 + sc, 0.0)                              # (TH*Wo, Cout)
        o_ref[...] = out.reshape(1, TH, Wo, Cout)

    return kernel


def fold_bn(gamma, beta, mean, var, eps=BN_EPS):
    scale = gamma / jnp.sqrt(var + eps)
    bias = beta - mean * scale
    return scale[None, :], bias[None, :]        # (1, C): broadcasts against (rows, C)


def bottleneck_pallas(x, params, stride):
    """Bottleneck block forward.  x: (N, H, W, Cin) float32 NHWC."""
    N, H, W, Cin = x.shape
    P = params["w1"].shape[1]
    Cout = params["w3"].shape[1]
    s = stride
    has_proj = "wsc" in params

    Ho, Wo = _out_size(H, s), _out_size(W, s)
    halo = 2 // s
    Hpar, Wpar = Ho + halo, Wo + halo
    # modest row tile: keeps per-step VMEM well under v7x's 64 MiB while still
    # amortizing the ~0.35us/step overhead; falls back to the full extent when
    # Ho is not 8-aligned (block then equals the full dim, which is allowed).
    TH = 8 if Ho % 8 == 0 else Ho
    grid = (N, Ho // TH)

    # -- wrapper-side preprocessing (cheap XLA ops, not kernel work) ----------
    # zero-pad spatially, then parity-decompose so the stride-2 blocks never
    # need strided loads inside the kernel.
    pad_b = s * Hpar - H - 1
    pad_r = s * Wpar - W - 1
    x_pad = jnp.pad(x, ((0, 0), (1, pad_b), (1, pad_r), (0, 0)))
    x_par = [x_pad[:, py::s, px::s, :] for py in range(s) for px in range(s)]

    # fold BN scales into the conv weights (static constant folding)
    w1f = params["w1"] * params["s1"]
    w2f = (params["w2"] * params["s2"]).reshape(9 * P, P)    # im2col weight (9P, P)
    w3f = params["w3"] * params["s3"]
    weights = [w1f, params["b1"], w2f, params["b2"], w3f, params["b3"]]
    if has_proj:
        weights += [params["wsc"] * params["ssc"], params["bsc"]]

    kernel = _make_bottleneck_kernel(H, W, Cin, P, Cout, s, TH, has_proj)

    x_spec = pl.BlockSpec((1, Hpar, Wpar, Cin), lambda n, r: (n, 0, 0, 0))
    in_specs = [x_spec] * (s * s)
    for wgt in weights:
        in_specs.append(
            pl.BlockSpec(wgt.shape, lambda n, r, nd=wgt.ndim: (0,) * nd))
    out_specs = pl.BlockSpec((1, TH, Wo, Cout), lambda n, r: (n, r, 0, 0))

    return pl.pallas_call(
        kernel,
        out_shape=jax.ShapeDtypeStruct((N, Ho, Wo, Cout), jnp.float32),
        grid_spec=pltpu.PrefetchScalarGridSpec(
            num_scalar_prefetch=0,
            grid=grid,
            in_specs=in_specs,
            out_specs=out_specs),
        compiler_params=pltpu.CompilerParams(
            dimension_semantics=("parallel", "parallel"),
            vmem_limit_bytes=32 * 1024 * 1024),
    )(*x_par, *weights)


def make_params(key, in_planes, planes, stride):
    cout = EXPANSION * planes
    keys = jax.random.split(key, 8)

    def bn_params(k, c):
        k1, k2, k3, k4 = jax.random.split(k, 4)
        gamma = jax.random.uniform(k1, (c,), jnp.float32, 0.5, 1.5)
        beta = jax.random.normal(k2, (c,), jnp.float32) * 0.1
        mean = jax.random.normal(k3, (c,), jnp.float32) * 0.1
        var = jax.random.uniform(k4, (c,), jnp.float32, 0.5, 1.5)
        return fold_bn(gamma, beta, mean, var)

    w1 = jax.random.normal(keys[0], (in_planes, planes), jnp.float32) * 0.1
    w2 = jax.random.normal(keys[1], (3, 3, planes, planes), jnp.float32) * 0.1
    w3 = jax.random.normal(keys[2], (planes, cout), jnp.float32) * 0.1
    s1, b1 = bn_params(keys[3], planes)
    s2, b2 = bn_params(keys[4], planes)
    s3, b3 = bn_params(keys[5], cout)
    params = dict(w1=w1, s1=s1, b1=b1, w2=w2, s2=s2, b2=b2, w3=w3, s3=s3, b3=b3)

    if (stride != 1) or (in_planes != cout):     # projection ("downsample") path
        wsc = jax.random.normal(keys[6], (in_planes, cout), jnp.float32) * 0.1
        ssc, bsc = bn_params(keys[7], cout)
        params.update(wsc=wsc, ssc=ssc, bsc=bsc)
    return params


def bottleneck_ref(x, params, stride):
    """Plain-JAX reference (NHWC), mirrors the PyTorch Bottleneck forward."""
    dn = ("NHWC", "HWIO", "NHWC")
    h1 = jnp.einsum("nhwc,cd->nhwd", x, params["w1"])
    h1 = jnp.maximum(h1 * params["s1"] + params["b1"], 0.0)
    h2 = lax.conv_general_dilated(h1, params["w2"], (stride, stride),
                                  ((1, 1), (1, 1)), dimension_numbers=dn)
    h2 = jnp.maximum(h2 * params["s2"] + params["b2"], 0.0)
    h3 = jnp.einsum("nhwc,cd->nhwd", h2, params["w3"])
    h3 = h3 * params["s3"] + params["b3"]
    xs = x[:, ::stride, ::stride, :]
    if "wsc" in params:
        sc = jnp.einsum("nhwc,cd->nhwd", xs, params["wsc"])
        sc = sc * params["ssc"] + params["bsc"]
    else:
        sc = xs
    return jnp.maximum(h3 + sc, 0.0)


if __name__ == "__main__":
    key = jax.random.PRNGKey(0)
    N, H, W = 2, 16, 16
    # (in_planes, planes, stride): identity shortcut, projection, strided projection
    configs = [
        (32, 8, 1),    # identity shortcut (in_planes == 4*planes), stride 1
        (8, 8, 1),     # projection shortcut, stride 1
        (32, 16, 2),   # projection shortcut, stride 2 (downsampling block)
    ]
    for i, (cin, planes, stride) in enumerate(configs):
        kx, kp, key = jax.random.split(key, 3)
        x = jax.random.normal(kx, (N, H, W, cin), jnp.float32)   # NHWC
        params = make_params(kp, cin, planes, stride)

        out = jax.block_until_ready(bottleneck_pallas(x, params, stride))
        ref = jax.block_until_ready(bottleneck_ref(x, params, stride))

        Ho, Wo = _out_size(H, stride), _out_size(W, stride)
        assert out.shape == (N, Ho, Wo, EXPANSION * planes), (i, out.shape)
        err = float(jnp.max(jnp.abs(out - ref)))
        assert jnp.allclose(out, ref, rtol=1e-4, atol=1e-4), (i, err)

    print("KERNEL_OK")
</pallas_src>

<mosaic_0001>
module attributes {stable_mosaic.version = 11 : i64} {
  func.func @kernel(%arg0: i32, %arg1: i32, %arg2: memref<1x18x18x32xf32, #tpu.memory_space<vmem>>, %arg3: memref<32x8xf32, #tpu.memory_space<vmem>>, %arg4: memref<1x8xf32, #tpu.memory_space<vmem>>, %arg5: memref<72x8xf32, #tpu.memory_space<vmem>>, %arg6: memref<1x8xf32, #tpu.memory_space<vmem>>, %arg7: memref<8x32xf32, #tpu.memory_space<vmem>>, %arg8: memref<1x32xf32, #tpu.memory_space<vmem>>, %arg9: memref<1x8x16x32xf32, #tpu.memory_space<vmem>>) attributes {dimension_semantics = [#tpu.dimension_semantics<parallel>, #tpu.dimension_semantics<parallel>], iteration_bounds = array<i64: 2, 2>, scalar_prefetch = 0 : i64, scratch_operands = 0 : i64, tpu.core_type = #tpu.core_type<tc>, window_params = [{transform_indices = @transform_0, window_bounds = array<i64: 1, 18, 18, 32>}, {pipeline_mode = #tpu.pipeline_mode<synchronous>, transform_indices = @transform_1, window_bounds = array<i64: 32, 8>}, {pipeline_mode = #tpu.pipeline_mode<synchronous>, transform_indices = @transform_2, window_bounds = array<i64: 1, 8>}, {pipeline_mode = #tpu.pipeline_mode<synchronous>, transform_indices = @transform_3, window_bounds = array<i64: 72, 8>}, {pipeline_mode = #tpu.pipeline_mode<synchronous>, transform_indices = @transform_4, window_bounds = array<i64: 1, 8>}, {pipeline_mode = #tpu.pipeline_mode<synchronous>, transform_indices = @transform_5, window_bounds = array<i64: 8, 32>}, {pipeline_mode = #tpu.pipeline_mode<synchronous>, transform_indices = @transform_6, window_bounds = array<i64: 1, 32>}, {transform_indices = @transform_7, window_bounds = array<i64: 1, 8, 16, 32>}]} {
    %c8_i32 = arith.constant 8 : i32
    %0 = arith.muli %arg1, %c8_i32 : i32
    %1 = tpu.assume_multiple %0, 8 : i32
    %2 = tpu.iota {dimensions = array<i32: 0>} : vector<10x18x8xi32>
    %3 = tpu.iota {dimensions = array<i32: 1>} : vector<10x18x8xi32>
    %4 = vector.broadcast %1 : i32 to vector<10x18x8xi32>
    %5 = arith.addi %4, %2 : vector<10x18x8xi32>
    %c1_i32 = arith.constant 1 : i32
    %6 = vector.broadcast %c1_i32 : i32 to vector<10x18x8xi32>
    %7 = arith.muli %6, %5 : vector<10x18x8xi32>
    %c1_i32_0 = arith.constant 1 : i32
    %8 = vector.broadcast %c1_i32_0 : i32 to vector<10x18x8xi32>
    %9 = arith.muli %8, %3 : vector<10x18x8xi32>
    %c0 = arith.constant 0 : index
    %c0_1 = arith.constant 0 : index
    %10 = vector.load %arg3[%c0, %c0_1] : memref<32x8xf32, #tpu.memory_space<vmem>>, vector<32x8xf32>
    %c0_2 = arith.constant 0 : index
    %c0_3 = arith.constant 0 : index
    %11 = vector.load %arg4[%c0_2, %c0_3] : memref<1x8xf32, #tpu.memory_space<vmem>>, vector<1x8xf32>
    %c0_4 = arith.constant 0 : index
    %12 = arith.index_cast %1 : i32 to index
    %c0_5 = arith.constant 0 : index
    %c0_6 = arith.constant 0 : index
    %13 = vector.load %arg2[%c0_4, %12, %c0_5, %c0_6] : memref<1x18x18x32xf32, #tpu.memory_space<vmem>>, vector<1x10x18x32xf32>
    %14 = vector.shape_cast %13 : vector<1x10x18x32xf32> to vector<10x18x32xf32>
    %15 = vector.shape_cast %14 : vector<10x18x32xf32> to vector<180x32xf32>
    %cst = arith.constant dense<0.000000e+00> : vector<180x8xf32>
    %16 = tpu.matmul %15, %10, %cst {dimension_numbers = #tpu.dot_dimension_numbers<[1], [0], [0], [1], [0, 0, 1, 1], [], []>} : vector<180x32xf32>, vector<32x8xf32>, vector<180x8xf32> -> vector<180x8xf32>
    %17 = vector.broadcast %11 : vector<1x8xf32> to vector<180x8xf32>
    %18 = arith.addf %16, %17 : vector<180x8xf32>
    %cst_7 = arith.constant 0.000000e+00 : f32
    %19 = vector.broadcast %cst_7 : f32 to vector<180x8xf32>
    %20 = arith.maximumf %18, %19 : vector<180x8xf32>
    %21 = vector.shape_cast %20 : vector<180x8xf32> to vector<10x18x8xf32>
    %c0_i32 = arith.constant 0 : i32
    %22 = vector.broadcast %c0_i32 : i32 to vector<10x18x8xi32>
    %23 = arith.addi %7, %22 : vector<10x18x8xi32>
    %c1_i32_8 = arith.constant 1 : i32
    %24 = vector.broadcast %c1_i32_8 : i32 to vector<10x18x8xi32>
    %25 = arith.cmpi sge, %23, %24 : vector<10x18x8xi32>
    %c0_i32_9 = arith.constant 0 : i32
    %26 = vector.broadcast %c0_i32_9 : i32 to vector<10x18x8xi32>
    %27 = arith.addi %7, %26 : vector<10x18x8xi32>
    %c16_i32 = arith.constant 16 : i32
    %28 = vector.broadcast %c16_i32 : i32 to vector<10x18x8xi32>
    %29 = arith.cmpi sle, %27, %28 : vector<10x18x8xi32>
    %30 = arith.andi %25, %29 : vector<10x18x8xi1>
    %c0_i32_10 = arith.constant 0 : i32
    %31 = vector.broadcast %c0_i32_10 : i32 to vector<10x18x8xi32>
    %32 = arith.addi %9, %31 : vector<10x18x8xi32>
    %c1_i32_11 = arith.constant 1 : i32
    %33 = vector.broadcast %c1_i32_11 : i32 to vector<10x18x8xi32>
    %34 = arith.cmpi sge, %32, %33 : vector<10x18x8xi32>
    %35 = arith.andi %30, %34 : vector<10x18x8xi1>
    %c0_i32_12 = arith.constant 0 : i32
    %36 = vector.broadcast %c0_i32_12 : i32 to vector<10x18x8xi32>
    %37 = arith.addi %9, %36 : vector<10x18x8xi32>
    %c16_i32_13 = arith.constant 16 : i32
    %38 = vector.broadcast %c16_i32_13 : i32 to vector<10x18x8xi32>
    %39 = arith.cmpi sle, %37, %38 : vector<10x18x8xi32>
    %40 = arith.andi %35, %39 : vector<10x18x8xi1>
    %cst_14 = arith.constant 0.000000e+00 : f32
    %41 = vector.broadcast %cst_14 : f32 to vector<10x18x8xf32>
    %42 = arith.select %40, %21, %41 : vector<10x18x8xi1>, vector<10x18x8xf32>
    %43 = vector.extract_strided_slice %42 {offsets = [0, 0, 0], sizes = [8, 16, 8], strides = [1, 1, 1]} : vector<10x18x8xf32> to vector<8x16x8xf32>
    %44 = vector.shape_cast %43 : vector<8x16x8xf32> to vector<128x8xf32>
    %45 = vector.extract_strided_slice %42 {offsets = [0, 1, 0], sizes = [8, 16, 8], strides = [1, 1, 1]} : vector<10x18x8xf32> to vector<8x16x8xf32>
    %46 = vector.shape_cast %45 : vector<8x16x8xf32> to vector<128x8xf32>
    %47 = vector.extract_strided_slice %42 {offsets = [0, 2, 0], sizes = [8, 16, 8], strides = [1, 1, 1]} : vector<10x18x8xf32> to vector<8x16x8xf32>
    %48 = vector.shape_cast %47 : vector<8x16x8xf32> to vector<128x8xf32>
    %49 = vector.extract_strided_slice %42 {offsets = [1, 0, 0], sizes = [8, 16, 8], strides = [1, 1, 1]} : vector<10x18x8xf32> to vector<8x16x8xf32>
    %50 = vector.shape_cast %49 : vector<8x16x8xf32> to vector<128x8xf32>
    %51 = vector.extract_strided_slice %42 {offsets = [1, 1, 0], sizes = [8, 16, 8], strides = [1, 1, 1]} : vector<10x18x8xf32> to vector<8x16x8xf32>
    %52 = vector.shape_cast %51 : vector<8x16x8xf32> to vector<128x8xf32>
    %53 = vector.extract_strided_slice %42 {offsets = [1, 2, 0], sizes = [8, 16, 8], strides = [1, 1, 1]} : vector<10x18x8xf32> to vector<8x16x8xf32>
    %54 = vector.shape_cast %53 : vector<8x16x8xf32> to vector<128x8xf32>
    %55 = vector.extract_strided_slice %42 {offsets = [2, 0, 0], sizes = [8, 16, 8], strides = [1, 1, 1]} : vector<10x18x8xf32> to vector<8x16x8xf32>
    %56 = vector.shape_cast %55 : vector<8x16x8xf32> to vector<128x8xf32>
    %57 = vector.extract_strided_slice %42 {offsets = [2, 1, 0], sizes = [8, 16, 8], strides = [1, 1, 1]} : vector<10x18x8xf32> to vector<8x16x8xf32>
    %58 = vector.shape_cast %57 : vector<8x16x8xf32> to vector<128x8xf32>
    %59 = vector.extract_strided_slice %42 {offsets = [2, 2, 0], sizes = [8, 16, 8], strides = [1, 1, 1]} : vector<10x18x8xf32> to vector<8x16x8xf32>
    %60 = vector.shape_cast %59 : vector<8x16x8xf32> to vector<128x8xf32>
    %61 = tpu.concatenate %44, %46, %48, %50, %52, %54, %56, %58, %60 in 1 : vector<128x8xf32>, vector<128x8xf32>, vector<128x8xf32>, vector<128x8xf32>, vector<128x8xf32>, vector<128x8xf32>, vector<128x8xf32>, vector<128x8xf32>, vector<128x8xf32> -> vector<128x72xf32>
    %c0_15 = arith.constant 0 : index
    %c0_16 = arith.constant 0 : index
    %62 = vector.load %arg5[%c0_15, %c0_16] : memref<72x8xf32, #tpu.memory_space<vmem>>, vector<72x8xf32>
    %cst_17 = arith.constant dense<0.000000e+00> : vector<128x8xf32>
    %63 = tpu.matmul %61, %62, %cst_17 {dimension_numbers = #tpu.dot_dimension_numbers<[1], [0], [0], [1], [0, 0, 1, 1], [], []>} : vector<128x72xf32>, vector<72x8xf32>, vector<128x8xf32> -> vector<128x8xf32>
    %c0_18 = arith.constant 0 : index
    %c0_19 = arith.constant 0 : index
    %64 = vector.load %arg6[%c0_18, %c0_19] : memref<1x8xf32, #tpu.memory_space<vmem>>, vector<1x8xf32>
    %65 = vector.broadcast %64 : vector<1x8xf32> to vector<128x8xf32>
    %66 = arith.addf %63, %65 : vector<128x8xf32>
    %cst_20 = arith.constant 0.000000e+00 : f32
    %67 = vector.broadcast %cst_20 : f32 to vector<128x8xf32>
    %68 = arith.maximumf %66, %67 : vector<128x8xf32>
    %c0_21 = arith.constant 0 : index
    %c0_22 = arith.constant 0 : index
    %69 = vector.load %arg7[%c0_21, %c0_22] : memref<8x32xf32, #tpu.memory_space<vmem>>, vector<8x32xf32>
    %cst_23 = arith.constant dense<0.000000e+00> : vector<128x32xf32>
    %70 = tpu.matmul %68, %69, %cst_23 {dimension_numbers = #tpu.dot_dimension_numbers<[1], [0], [0], [1], [0, 0, 1, 1], [], []>} : vector<128x8xf32>, vector<8x32xf32>, vector<128x32xf32> -> vector<128x32xf32>
    %c0_24 = arith.constant 0 : index
    %c0_25 = arith.constant 0 : index
    %71 = vector.load %arg8[%c0_24, %c0_25] : memref<1x32xf32, #tpu.memory_space<vmem>>, vector<1x32xf32>
    %72 = vector.broadcast %71 : vector<1x32xf32> to vector<128x32xf32>
    %73 = arith.addf %70, %72 : vector<128x32xf32>
    %74 = vector.extract_strided_slice %14 {offsets = [1, 1, 0], sizes = [8, 16, 32], strides = [1, 1, 1]} : vector<10x18x32xf32> to vector<8x16x32xf32>
    %75 = vector.shape_cast %74 : vector<8x16x32xf32> to vector<128x32xf32>
    %76 = arith.addf %73, %75 : vector<128x32xf32>
    %cst_26 = arith.constant 0.000000e+00 : f32
    %77 = vector.broadcast %cst_26 : f32 to vector<128x32xf32>
    %78 = arith.maximumf %76, %77 : vector<128x32xf32>
    %79 = vector.shape_cast %78 : vector<128x32xf32> to vector<1x8x16x32xf32>
    %c0_27 = arith.constant 0 : index
    %c0_28 = arith.constant 0 : index
    %c0_29 = arith.constant 0 : index
    %c0_30 = arith.constant 0 : index
    %80 = vector.load %arg9[%c0_27, %c0_28, %c0_29, %c0_30] : memref<1x8x16x32xf32, #tpu.memory_space<vmem>>, vector<1x8x16x32xf32>
    tpu.vector_store %arg9[%c0_27, %c0_28, %c0_29, %c0_30], %79 {strides = array<i32>} : memref<1x8x16x32xf32, #tpu.memory_space<vmem>>, vector<1x8x16x32xf32>,
    return
  }
  func.func @transform_0(%arg0: i32, %arg1: i32) -> (i32, i32, i32, i32) {
    %c0_i32 = arith.constant 0 : i32
    %c0_i32_0 = arith.constant 0 : i32
    %c0_i32_1 = arith.constant 0 : i32
    %c0_i32_2 = arith.constant 0 : i32
    return %arg0, %c0_i32, %c0_i32_0, %c0_i32_1 : i32, i32, i32, i32
  }
  func.func @transform_1(%arg0: i32, %arg1: i32) -> (i32, i32) {
    %c0_i32 = arith.constant 0 : i32
    %c0_i32_0 = arith.constant 0 : i32
    %c0_i32_1 = arith.constant 0 : i32
    return %c0_i32, %c0_i32_0 : i32, i32
  }
  func.func @transform_2(%arg0: i32, %arg1: i32) -> (i32, i32) {
    %c0_i32 = arith.constant 0 : i32
    %c0_i32_0 = arith.constant 0 : i32
    %c0_i32_1 = arith.constant 0 : i32
    return %c0_i32, %c0_i32_0 : i32, i32
  }
  func.func @transform_3(%arg0: i32, %arg1: i32) -> (i32, i32) {
    %c0_i32 = arith.constant 0 : i32
    %c0_i32_0 = arith.constant 0 : i32
    %c0_i32_1 = arith.constant 0 : i32
    return %c0_i32, %c0_i32_0 : i32, i32
  }
  func.func @transform_4(%arg0: i32, %arg1: i32) -> (i32, i32) {
    %c0_i32 = arith.constant 0 : i32
    %c0_i32_0 = arith.constant 0 : i32
    %c0_i32_1 = arith.constant 0 : i32
    return %c0_i32, %c0_i32_0 : i32, i32
  }
  func.func @transform_5(%arg0: i32, %arg1: i32) -> (i32, i32) {
    %c0_i32 = arith.constant 0 : i32
    %c0_i32_0 = arith.constant 0 : i32
    %c0_i32_1 = arith.constant 0 : i32
    return %c0_i32, %c0_i32_0 : i32, i32
  }
  func.func @transform_6(%arg0: i32, %arg1: i32) -> (i32, i32) {
    %c0_i32 = arith.constant 0 : i32
    %c0_i32_0 = arith.constant 0 : i32
    %c0_i32_1 = arith.constant 0 : i32
    return %c0_i32, %c0_i32_0 : i32, i32
  }
  func.func @transform_7(%arg0: i32, %arg1: i32) -> (i32, i32, i32, i32) {
    %c0_i32 = arith.constant 0 : i32
    %c0_i32_0 = arith.constant 0 : i32
    %c0_i32_1 = arith.constant 0 : i32
    return %arg0, %arg1, %c0_i32, %c0_i32_0 : i32, i32, i32, i32
  }
}

</mosaic_0001>

<bundles_post_ra>
// kernel: tpu_custom_call.1
= control target key start
LH: loop header
LB: loop body
LE: loop exit
PB: predicated region body
PF: predicated region fallthrough
CT: control target
= control target key end

     0   :  { %s5692_s0 = inlined_call_operand.vmem [shape: f32[2,18,18,32], index: 0, kind: input, shape index: {}]   ;;  %s5693_s1 = inlined_call_operand.vmem [shape: f32[32,8], index: 1, kind: input, shape index: {}]   ;;  %s5694_s2 = inlined_call_operand.vmem [shape: f32[1,8], index: 2, kind: input, shape index: {}]   ;;  %s5695_s3 = inlined_call_operand.vmem [shape: f32[72,8], index: 3, kind: input, shape index: {}]   ;;  %s5696_s4 = inlined_call_operand.vmem [shape: f32[1,8], index: 4, kind: input, shape index: {}]   ;;  %s5697_s5 = inlined_call_operand.vmem [shape: f32[8,32], index: 5, kind: input, shape index: {}]   ;;  %s5698_s6 = inlined_call_operand.vmem [shape: f32[1,32], index: 6, kind: input, shape index: {}]   ;;  %s5699_s7 = inlined_call_operand.hbm [shape: f32[2,16,16,32], index: 7, kind: output, shape index: {}]  }
   0x1   :  { %5715 = sst [smem:[#allocation5_spill]] %s5692_s0 }
   0x2   :  { %12 = vsyncpa [#allocation3], 0 }
   0x3   :  { %14 = vsyncpa [#allocation3 + $0x1], 0  ;;  %s4270_s24 = smov 0   ;;  %s4272_s25 = smov 0  }
   0x4   :  { %s4274_s26 = smov 0   ;;  %s4276_s27 = smov 0  }
   0x5   :  { %s4278_s28 = smov 0   ;;  %s4280_s29 = smov 0  }
   0x6   :  { %s4282_s30 = smov 0   ;;  %s4284_s8 = smov 0  }
   0x7 LB: > { %s3670_s9 = sadd.s32 4294967295, %s4214_s8   ;;  %s3671_s10 = sadd.s32 4294967294, %s4214_s8   ;;  %s4214_s8 = sphi %s4284_s8, %s20_s8   ;;  %s4210_s30 = sphi %s4282_s30, %s5760_s30   ;;  %s4206_s29 = sphi %s4280_s29, %s5759_s29   ;;  %s4202_s28 = sphi %s4278_s28, %s5758_s28   ;;  %s4198_s27 = sphi %s4276_s27, %s5757_s27   ;;  %s4194_s26 = sphi %s4274_s26, %s5756_s26   ;;  %s4190_s25 = sphi %s4272_s25, %s5755_s25   ;;  %s4186_s24 = sphi %s4270_s24, %s5754_s24  }
   0x8   : > { %s29_s11 = sadd.s32 1, %s4206_s29  ;;  %s32_s12 = sadd.s32 1, %s4210_s30 }
   0x9   : > { %p30_p0 = scmp.ge.s32.totalorder %s29_s11, 2  ;;  %p203_p1 = scmp.ne.s32.totalorder %s4194_s26, %s4190_s25 }
   0xa   : > { %p204_p2 = scmp.eq.s32.totalorder %s3670_s9, 3  ;;  %p209_p5 = scmp.ne.s32.totalorder %s4190_s25, %s4186_s24 }
   0xb   : > { %s5762_s11 = smov (%p30_p0, %s29_s11), 0  ;;  %s5764_s12 = smov (!%p30_p0, %s32_s12), %s4210_s30 }
   0xc   : > { %s189_s13 = ssub.s32 %s4206_s29, %s5762_s11  ;;  %p4321_p3 = por %p204_p2, %p203_p1 }
   0xd   : > { %p34_p4 = scmp.ge.s32.totalorder %s5764_s12, 2  ;;  %p210_p6 = scmp.eq.s32.totalorder %s3671_s10, 3 }
   0xe   : > { %p3674_p7 = scmp.ge.s32.totalorder %s4214_s8, 1  ;;  %p254_p9 = scmp.lt.s32.totalorder %s4214_s8, 5 }
   0xf   : > { %s5766_s12 = smov (%p34_p4, %s5764_s12), 0  ;;  %p4330_p8 = por %p210_p6, %p209_p5 }
  0x10   : > { %s188_s16 = ssub.s32 %s4210_s30, %s5766_s12  ;;  %s193_s17 = sadd.s32 1, %s4194_s26 }
  0x11   : > { %s190_s18 = sor.u32 %s189_s13, %s188_s16  ;;  %p255_p10 = pnand %p3674_p7, %p254_p9 }
  0x12   : > { %p191_p11 = scmp.eq.s32.totalorder %s190_s18, 0  ;;  %v307_v0 = vld [vmem:[%s5693_s1] sm:$0xff] (!%p255_p10)  ;;  %v308_v1 = vld [vmem:[%s5693_s1 + $0x8] sm:$0xff] (!%p255_p10)  ;;  %v309_v2 = vld [vmem:[%s5693_s1 + $0x10] sm:$0xff] (!%p255_p10)  ;;  %v293_v3 = vlaneseq (!%p255_p10)  ;;  %v4216_v4 = vmov (!%p255_p10), 0.0|0.0   ;;  %vm4217_vm0 = vmmov (!%p255_p10), 0  }
  0x13   : > { %258 = sbr.rel (%p255_p10) target bundleno = 1104 (0x450), region = 48  ;;  %3961 = vmatprep.subr.bf16.mxu0 (!%p255_p10), %v4216_v4  ;;  %v3962_v5 = vpack.c.bf16 (!%p255_p10), %v308_v1, %v307_v0  ;;  %v310_v6 = vld [vmem:[%s5693_s1 + $0x18] sm:$0xff] (!%p255_p10)  ;;  %v4218_v7 = vmov (!%p255_p10), 0.0   ;;  %p286_p12 = scmp.lt.s32.totalorder (!%p255_p10), %s4202_s28, 1  ;;  %v4219_v9 = vmov (!%p255_p10), 1983009808  }
  0x14   : > { %s4339_s19 = scalar_select %p191_p11, %s4194_s26, %s193_s17  }
  0x15   : > { %3824 = vmatprep.mubr.msk.f32.mxu0 (!%p255_p10), %vm4217_vm0, %v4218_v7  ;;  %v4356_v8 = vshrl.u32 (!%p255_p10), %v293_v3, 7  ;;  %v376_v10 = vunpack.c.l.s4 (!%p255_p10), %v4219_v9  ;;  %3963 = vmatpush3.bf16.msra.mxu0 (!%p255_p10), %v3962_v5  ;;  %v3965_v11 = vpack.c.bf16 (!%p255_p10), %v310_v6, %v309_v2  ;;  %s3678_s18 = smul.u32 (!%p255_p10), 192, %s4198_s27  ;;  %s5718_s0 = sld [smem:[#allocation5_spill]] (!%p255_p10)  ;;  %vm1172_vm1 = vcmask (!%p255_p10), 261120  }
  0x16   : > { %3964 = vmatprep.subr.bf16.mxu0 (!%p255_p10), %v4216_v4  ;;  %s3677_s16 = sshll.u32 (!%p255_p10), %s4198_s27, 3  ;;  %vm5714_vm9 = vcmask (!%p255_p10), 1045504   ;;  %vm2417_vm10 = vcmask (!%p255_p10), 1046528   ;;  %s5706_s21 = smov (!%p255_p10), 32  }
  0x17   : > { %v377_v12 = vunpack.c.0.s8 (!%p255_p10), %v376_v10  ;;  %vm1857_vm4 = vcmp.ge.s32.totalorder (!%p255_p10), %v4356_v8, 1  ;;  %s5712_s22 = smov (!%p255_p10), 40   ;;  %s5700_s10 = smov (!%p255_p10), 56  }
  0x18   : > { %s4227_s13 = smov (!%p255_p10), 64  }
  0x19   : > { %v4361_v13 = vsub.s32 (!%p255_p10), %v377_v12, %v4356_v8  ;;  %3966 = vmatpush3.bf16.msra.mxu0 (!%p255_p10), %v3965_v11 }
  0x1a   : > { %s287_s17 = scalar_select %p286_p12, %s4202_s28, 1 }
  0x1c   : > { %s3983_s20 = smul.u32 432, %s287_s17  ;;  %s5710_s17 = smov 16  }
  0x1e   : > { %s290_s23 = scalar_lea.vmem %s5718_s0, %s3983_s20  ;;  %s5702_s20 = smov 24  }
  0x1f   : > { %s4366_s9 = scalar_lea.vmem %s290_s23, %s3678_s18  ;;  %s5708_s18 = smov 8  }
  0x20   : > { %v314_v14 = vld [vmem:[%s4366_s9] sm:$0xff]  ;;  %v315_v15 = vld [vmem:[%s4366_s9 + $0x8] sm:$0xff]  ;;  %v317_v20 = vld [vmem:[%s4366_s9 + $0x18] sm:$0xff]  ;;  %s5704_s23 = smov 48  }
  0x21   : > { %v374_v16 = vcombine.high %v314_v14, %v314_v14  ;;  %v381_v17 = vrot.slane %v314_v14, %v4361_v13  ;;  %v391_v18 = vcombine.high %v315_v15, %v315_v15  ;;  %v398_v19 = vrot.slane %v315_v15, %v4361_v13  ;;  %v318_v21 = vld [vmem:[%s4366_s9 + $0x20] sm:$0xff]  ;;  %v3679_v28 = vld.sshfl [vmem:[%s4366_s9 + $0x10] sm:$0x3 pattern:$0x76325410]  ;;  %v321_v51 = vld [vmem:[%s4366_s9 + $0x38] sm:$0xff] }
  0x22   : > { %v415_v22 = vcombine.high %v317_v20, %v317_v20  ;;  %v422_v23 = vrot.slane %v317_v20, %v4361_v13  ;;  %v432_v31 = vcombine.high %v318_v21, %v318_v21  ;;  %v439_v32 = vrot.slane %v318_v21, %v4361_v13  ;;  %v320_v39 = vld [vmem:[%s4366_s9 + $0x30] sm:$0xff]  ;;  %v4112_v49 = vld.sshfl [vmem:[%s4366_s9 + $0x28] sm:$0x3 pattern:$0x76325410]  ;;  %v326_v20 = vld [vmem:[%s4366_s9 + $0x60] sm:$0xff] }
  0x23   : > { %v388_v24 = vrot.slane %v374_v16, %v4361_v13  ;;  %v389_v25 = vcombine.high %v381_v17, %v381_v17  ;;  %v405_v26 = vrot.slane %v391_v18, %v4361_v13  ;;  %v406_v27 = vcombine.high %v398_v19, %v398_v19  ;;  %v323_v1 = vld [vmem:[%s4366_s9 + $0x48] sm:$0xff]  ;;  %v4113_v5 = vld.sshfl [vmem:[%s4366_s9 + $0x40] sm:$0x3 pattern:$0x76325410]  ;;  %v324_v14 = vld [vmem:[%s4366_s9 + $0x50] sm:$0xff] }
  0x24   : > { %v429_v29 = vrot.slane %v415_v22, %v4361_v13  ;;  %v430_v30 = vcombine.high %v422_v23, %v422_v23  ;;  %v824_v37 = vcombine.low %v3679_v28, %v422_v23  ;;  %v446_v45 = vrot.slane %v432_v31, %v4361_v13 }
  0x25   : > { %v390_v33 = vcombine.high %v388_v24, %v388_v24  ;;  %v790_v34 = vcombine.low %v381_v17, %v389_v25  ;;  %v407_v35 = vcombine.high %v405_v26, %v405_v26  ;;  %v807_v36 = vcombine.low %v398_v19, %v406_v27 }
  0x26   : > { %v825_v38 = vcombine.low %v430_v30, %v429_v29  ;;  %v431_v43 = vcombine.high %v429_v29, %v429_v29  ;;  %v447_v46 = vcombine.high %v439_v32, %v439_v32  ;;  %v463_v50 = vrot.slane %v320_v39, %v4361_v13 }
  0x27   : > { %v791_v40 = vcombine.low %v388_v24, %v390_v33  ;;  %v798_v41 = vrot.slane %v790_v34, %v4361_v13  ;;  %v808_v42 = vcombine.low %v405_v26, %v407_v35  ;;  %v815_v44 = vrot.slane %v807_v36, %v4361_v13  ;;  %v4114_v35 = vld.sshfl [vmem:[%s4366_s9 + $0x58] sm:$0x3 pattern:$0x76325410]  ;;  %v327_v36 = vld [vmem:[%s4366_s9 + $0x68] sm:$0xff] }
  0x28   : > { %v456_v52 = vcombine.high %v320_v39, %v320_v39  ;;  %v832_v54 = vrot.slane %v824_v37, %v4361_v13  ;;  %v839_v55 = vrot.slane %v825_v38, %v4361_v13  ;;  %v841_v56 = vcombine.low %v431_v43, %v439_v32 }
  0x29   : > { %v805_v47 = vrot.slane %v791_v40, %v4361_v13  ;;  %v822_v48 = vrot.slane %v808_v42, %v4361_v13  ;;  %v842_v58 = vcombine.low %v447_v46, %v446_v45  ;;  %v448_v59 = vcombine.high %v446_v45, %v446_v45 }
  0x2a   : > { %v471_v60 = vcombine.high %v463_v50, %v463_v50  ;;  %v470_v61 = vrot.slane %v456_v52, %v4361_v13  ;;  %v480_v62 = vrot.slane %v321_v51, %v4361_v13  ;;  %v473_v63 = vcombine.high %v321_v51, %v321_v51 }
  0x2b   : > { %v806_v53 = vcombine.low %v798_v41, %v805_v47  ;;  %v823_v57 = vcombine.low %v815_v44, %v822_v48  ;;  %v840_v0 = vcombine.low %v832_v54, %v839_v55  ;;  %v849_v2 = vrot.slane %v841_v56, %v4361_v13  ;;  %v329_v56 = vld [vmem:[%s4366_s9 + $0x78] sm:$0xff] }
  0x2c   : > { %v856_v3 = vrot.slane %v842_v58, %v4361_v13  ;;  %v858_v4 = vcombine.low %v448_v59, %v4112_v49  ;;  %v497_v6 = vcombine.high %v323_v1, %v323_v1  ;;  %v859_v9 = vcombine.low %v463_v50, %v471_v60 }
  0x2d   : > { %3825 = vmatmul.mubr.msk.f32.vlgmr.msra.gmra.mrb[0].mxu0 %vm1172_vm1, %v806_v53  ;;  %v472_v10 = vcombine.high %v470_v61, %v470_v61  ;;  %v488_v11 = vcombine.high %v480_v62, %v480_v62  ;;  %v487_v12 = vrot.slane %v473_v63, %v4361_v13  ;;  %v504_v15 = vrot.slane %v323_v1, %v4361_v13 }
  0x2e   : > { %3827 = vmatprep.mubr.msk.f32.mxu0 %vm4217_vm0, %v4218_v7  ;;  %v857_v16 = vcombine.low %v849_v2, %v856_v3  ;;  %v866_v17 = vrot.slane %v858_v4, %v4361_v13  ;;  %v511_v18 = vrot.slane %v497_v6, %v4361_v13  ;;  %v514_v19 = vcombine.high %v324_v14, %v324_v14  ;;  %v330_v3 = vld [vmem:[%s4366_s9 + $0x80] sm:$0xff] }
  0x2f   : > { %v873_v21 = vrot.slane %v859_v9, %v4361_v13  ;;  %v875_v22 = vcombine.low %v470_v61, %v472_v10  ;;  %v876_v23 = vcombine.low %v480_v62, %v488_v11  ;;  %v489_v24 = vcombine.high %v487_v12, %v487_v12  ;;  %v4115_v62 = vld.sshfl [vmem:[%s4366_s9 + $0x70] sm:$0x3 pattern:$0x76325410] }
  0x30   : > { %v893_v25 = vcombine.low %v4113_v5, %v504_v15  ;;  %v538_v26 = vcombine.high %v326_v20, %v326_v20  ;;  %v512_v27 = vcombine.high %v504_v15, %v504_v15  ;;  %v513_v28 = vcombine.high %v511_v18, %v511_v18 }
  0x31   : > { %3828 = vmatmul.mubr.msk.f32.gmra.mrb[2].mxu0 %vm1172_vm1, %v823_v57  ;;  %v521_v29 = vrot.slane %v324_v14, %v4361_v13  ;;  %v528_v30 = vrot.slane %v514_v19, %v4361_v13  ;;  %v874_v31 = vcombine.low %v866_v17, %v873_v21  ;;  %v883_v32 = vrot.slane %v875_v22, %v4361_v13  ;;  %v4116_v22 = vld.sshfl [vmem:[%s4366_s9 + $0x88] sm:$0x3 pattern:$0x76325410] }
  0x32   : > { %3830 = vmatprep.mubr.msk.f32.mxu0 %vm4217_vm0, %v4218_v7  ;;  %v890_v33 = vrot.slane %v876_v23, %v4361_v13  ;;  %v892_v34 = vcombine.low %v487_v12, %v489_v24  ;;  %v545_v38 = vrot.slane %v326_v20, %v4361_v13  ;;  %v552_v39 = vrot.slane %v538_v26, %v4361_v13 }
  0x33   : > { %v529_v37 = vcombine.high %v521_v29, %v521_v29  ;;  %v909_v40 = vcombine.low %v512_v27, %v511_v18  ;;  %v910_v41 = vcombine.low %v513_v28, %v521_v29  ;;  %v530_v42 = vcombine.high %v528_v30, %v528_v30  ;;  %v333_v27 = vld [vmem:[%s4366_s9 + $0x98] sm:$0xff] }
  0x34   : > { %v891_v43 = vcombine.low %v883_v32, %v890_v33  ;;  %v900_v44 = vrot.slane %v892_v34, %v4361_v13  ;;  %v907_v45 = vrot.slane %v893_v25, %v4361_v13  ;;  %v555_v46 = vcombine.high %v327_v36, %v327_v36 }
  0x35   : > { %3831 = vmatmul.mubr.msk.f32.gmra.mrb[4].mxu0 %vm1172_vm1, %v840_v0  ;;  %v553_v47 = vcombine.high %v545_v38, %v545_v38  ;;  %v554_v48 = vcombine.high %v552_v39, %v552_v39  ;;  %v917_v49 = vrot.slane %v909_v40, %v4361_v13  ;;  %v924_v50 = vrot.slane %v910_v41, %v4361_v13 }
  0x36   : > { %3833 = vmatprep.mubr.msk.f32.mxu0 %vm4217_vm0, %v4218_v7  ;;  %v926_v51 = vcombine.low %v529_v37, %v528_v30  ;;  %v927_v52 = vcombine.low %v530_v42, %v4114_v35  ;;  %v908_v53 = vcombine.low %v900_v44, %v907_v45  ;;  %v562_v54 = vrot.slane %v327_v36, %v4361_v13  ;;  %v4117_v44 = vld.sshfl [vmem:[%s4366_s9 + $0xa0] sm:$0x3 pattern:$0x76325410]  ;;  %v335_v45 = vld [vmem:[%s4366_s9 + $0xa8] sm:$0xff] }
  0x37   : > { %v569_v55 = vrot.slane %v555_v46, %v4361_v13  ;;  %v943_v57 = vcombine.low %v545_v38, %v553_v47  ;;  %v944_v58 = vcombine.low %v552_v39, %v554_v48  ;;  %v925_v59 = vcombine.low %v917_v49, %v924_v50  ;;  %v336_v50 = vld [vmem:[%s4366_s9 + $0xb0] sm:$0xff] }
  0x38   : > { %v934_v60 = vrot.slane %v926_v51, %v4361_v13  ;;  %v941_v61 = vrot.slane %v927_v52, %v4361_v13  ;;  %v570_v63 = vcombine.high %v562_v54, %v562_v54  ;;  %v579_v1 = vcombine.high %v329_v56, %v329_v56 }
  0x39   : > { %3834 = vmatmul.mubr.msk.f32.gmra.mrb[6].mxu0 %vm1172_vm1, %v857_v16  ;;  %v571_v0 = vcombine.high %v569_v55, %v569_v55  ;;  %v586_v2 = vrot.slane %v329_v56, %v4361_v13  ;;  %v951_v4 = vrot.slane %v943_v57, %v4361_v13  ;;  %v958_v5 = vrot.slane %v944_v58, %v4361_v13  ;;  %v332_v16 = vld [vmem:[%s4366_s9 + $0x90] sm:$0xff] }
  0x3a   : > { %3836 = vmatprep.mubr.msk.f32.mxu0 %vm4217_vm0, %v4218_v7  ;;  %v942_v6 = vcombine.low %v934_v60, %v941_v61  ;;  %v596_v9 = vcombine.high %v330_v3, %v330_v3  ;;  %v603_v10 = vrot.slane %v330_v3, %v4361_v13  ;;  %v960_v11 = vcombine.low %v562_v54, %v570_v63 }
  0x3b   : > { %v961_v12 = vcombine.low %v569_v55, %v571_v0  ;;  %v593_v14 = vrot.slane %v579_v1, %v4361_v13  ;;  %v594_v15 = vcombine.high %v586_v2, %v586_v2  ;;  %v959_v17 = vcombine.low %v951_v4, %v958_v5  ;;  %v4118_v4 = vld.sshfl [vmem:[%s4366_s9 + $0xb8] sm:$0x3 pattern:$0x76325410] }
  0x3c   : > { %v977_v18 = vcombine.low %v4115_v62, %v586_v2  ;;  %v610_v20 = vrot.slane %v596_v9, %v4361_v13  ;;  %v611_v21 = vcombine.high %v603_v10, %v603_v10  ;;  %v627_v23 = vrot.slane %v332_v16, %v4361_v13 }
  0x3d   : > { %3837 = vmatmul.mubr.msk.f32.gmra.mrb[8].mxu0 %vm1172_vm1, %v874_v31  ;;  %v595_v19 = vcombine.high %v593_v14, %v593_v14  ;;  %v968_v24 = vrot.slane %v960_v11, %v4361_v13  ;;  %v975_v25 = vrot.slane %v961_v12, %v4361_v13  ;;  %v978_v26 = vcombine.low %v594_v15, %v593_v14 }
  0x3e   : > { %3839 = vmatprep.mubr.msk.f32.mxu0 %vm4217_vm0, %v4218_v7  ;;  %v620_v28 = vcombine.high %v332_v16, %v332_v16  ;;  %v985_v29 = vrot.slane %v977_v18, %v4361_v13  ;;  %v612_v30 = vcombine.high %v610_v20, %v610_v20  ;;  %v995_v32 = vcombine.low %v611_v21, %v610_v20 }
  0x3f   : > { %v994_v31 = vcombine.low %v595_v19, %v603_v10  ;;  %v635_v33 = vcombine.high %v627_v23, %v627_v23  ;;  %v644_v34 = vrot.slane %v333_v27, %v4361_v13  ;;  %v976_v35 = vcombine.low %v968_v24, %v975_v25  ;;  %v338_v25 = vld [vmem:[%s4366_s9 + $0xc0] sm:$0xff] }
  0x40   : > { %v992_v36 = vrot.slane %v978_v26, %v4361_v13  ;;  %v634_v37 = vrot.slane %v620_v28, %v4361_v13  ;;  %v637_v38 = vcombine.high %v333_v27, %v333_v27  ;;  %v1011_v39 = vcombine.low %v612_v30, %v4116_v22 }
  0x41   : > { %3840 = vmatmul.mubr.msk.f32.gmra.mrb[10].mxu0 %vm1172_vm1, %v891_v43  ;;  %v1002_v40 = vrot.slane %v994_v31, %v4361_v13  ;;  %v1009_v41 = vrot.slane %v995_v32, %v4361_v13  ;;  %v1012_v42 = vcombine.low %v627_v23, %v635_v33  ;;  %v652_v43 = vcombine.high %v644_v34, %v644_v34 }
  0x42   : > { %3842 = vmatprep.mubr.msk.f32.mxu0 %vm4217_vm0, %v4218_v7  ;;  %v993_v46 = vcombine.low %v985_v29, %v992_v36  ;;  %v636_v47 = vcombine.high %v634_v37, %v634_v37  ;;  %v651_v48 = vrot.slane %v637_v38, %v4361_v13  ;;  %v661_v49 = vcombine.high %v335_v45, %v335_v45  ;;  %v339_v29 = vld [vmem:[%s4366_s9 + $0xc8] sm:$0xff] }
  0x43   : > { %v1019_v51 = vrot.slane %v1011_v39, %v4361_v13  ;;  %v1010_v52 = vcombine.low %v1002_v40, %v1009_v41  ;;  %v1029_v54 = vcombine.low %v644_v34, %v652_v43  ;;  %v668_v55 = vrot.slane %v335_v45, %v4361_v13 }
  0x44   : > { %v1028_v56 = vcombine.low %v634_v37, %v636_v47  ;;  %v653_v57 = vcombine.high %v651_v48, %v651_v48  ;;  %v675_v58 = vrot.slane %v661_v49, %v4361_v13  ;;  %v685_v60 = vrot.slane %v336_v50, %v4361_v13  ;;  %v341_v47 = vld [vmem:[%s4366_s9 + $0xd8] sm:$0xff] }
  0x45   : > { %3843 = vmatmul.mubr.msk.f32.gmra.mrb[12].mxu0 %vm1172_vm1, %v908_v53  ;;  %v1026_v53 = vrot.slane %v1012_v42, %v4361_v13  ;;  %v1043_v62 = vrot.slane %v1029_v54, %v4361_v13  ;;  %v1046_v63 = vcombine.low %v4117_v44, %v668_v55  ;;  %v676_v0 = vcombine.high %v668_v55, %v668_v55 }
  0x46   : > { %3845 = vmatprep.mubr.msk.f32.mxu0 %vm4217_vm0, %v4218_v7  ;;  %v1036_v1 = vrot.slane %v1028_v56, %v4361_v13  ;;  %v1045_v2 = vcombine.low %v651_v48, %v653_v57  ;;  %v677_v3 = vcombine.high %v675_v58, %v675_v58  ;;  %v693_v10 = vcombine.high %v685_v60, %v685_v60 }
  0x47   : > { %v1027_v61 = vcombine.low %v1019_v51, %v1026_v53  ;;  %v1062_v9 = vcombine.low %v676_v0, %v675_v58  ;;  %v702_v26 = vcombine.high %v338_v25, %v338_v25  ;;  %v709_v27 = vrot.slane %v338_v25, %v4361_v13  ;;  %v342_v58 = vld [vmem:[%s4366_s9 + $0xe0] sm:$0xff] }
  0x48   : > { %v1044_v11 = vcombine.low %v1036_v1, %v1043_v62  ;;  %v1053_v12 = vrot.slane %v1045_v2, %v4361_v13  ;;  %v1063_v14 = vcombine.low %v677_v3, %v685_v60  ;;  %v719_v32 = vcombine.high %v339_v29, %v339_v29 }
  0x49   : > { %3846 = vmatmul.mubr.msk.f32.gmra.mrb[14].mxu0 %vm1172_vm1, %v925_v59  ;;  %v678_v59 = vcombine.high %v336_v50, %v336_v50  ;;  %v1070_v16 = vrot.slane %v1062_v9, %v4361_v13  ;;  %v716_v28 = vrot.slane %v702_v26, %v4361_v13  ;;  %v717_v30 = vcombine.high %v709_v27, %v709_v27  ;;  %v4119_v50 = vld.sshfl [vmem:[%s4366_s9 + $0xd0] sm:$0x3 pattern:$0x76325410] }
  0x4a   : > { %3848 = vmatprep.mubr.msk.f32.mxu0 %vm4217_vm0, %v4218_v7  ;;  %v1077_v18 = vrot.slane %v1063_v14, %v4361_v13  ;;  %v733_v36 = vrot.slane %v719_v32, %v4361_v13  ;;  %v743_v48 = vcombine.high %v341_v47, %v341_v47  ;;  %v750_v49 = vrot.slane %v341_v47, %v4361_v13 }
  0x4b   : > { %v692_v5 = vrot.slane %v678_v59, %v4361_v13  ;;  %v718_v31 = vcombine.high %v716_v28, %v716_v28  ;;  %v1096_v33 = vcombine.low %v709_v27, %v717_v30  ;;  %v760_v59 = vcombine.high %v342_v58, %v342_v58 }
  0x4c   : > { %v1078_v21 = vcombine.low %v1070_v16, %v1077_v18  ;;  %v735_v40 = vcombine.high %v733_v36, %v733_v36  ;;  %v757_v51 = vrot.slane %v743_v48, %v4361_v13  ;;  %v1130_v53 = vcombine.low %v4119_v50, %v750_v49 }
  0x4d   : > { %3849 = vmatmul.mubr.msk.f32.gmra.mrb[16].mxu0 %vm1172_vm1, %v942_v6  ;;  %v1060_v6 = vrot.slane %v1046_v63, %v4361_v13  ;;  %v694_v15 = vcombine.high %v692_v5, %v692_v5  ;;  %v1079_v19 = vcombine.low %v693_v10, %v692_v5  ;;  %v1097_v34 = vcombine.low %v716_v28, %v718_v31 }
  0x4e   : > { %3851 = vmatprep.mubr.msk.f32.mxu0 %vm4217_vm0, %v4218_v7  ;;  %v1104_v37 = vrot.slane %v1096_v33, %v4361_v13  ;;  %v1114_v43 = vcombine.low %v733_v36, %v735_v40  ;;  %v1138_v55 = vrot.slane %v1130_v53, %v4361_v13  ;;  %v767_v60 = vrot.slane %v342_v58, %v4361_v13 }
  0x4f   : > { %v1080_v20 = vcombine.low %v694_v15, %v4118_v4  ;;  %v1087_v22 = vrot.slane %v1079_v19, %v4361_v13  ;;  %v1111_v38 = vrot.slane %v1097_v34, %v4361_v13  ;;  %v774_v62 = vrot.slane %v760_v59, %v4361_v13 }
  0x50   : > { %v1128_v45 = vrot.slane %v1114_v43, %v4361_v13  ;;  %v775_v63 = vcombine.high %v767_v60, %v767_v60  ;;  %v4563_v25 = vadd.s32 16, %v4356_v8 }
  0x51   : > { %3852 = vmatmul.mubr.msk.f32.gmra.mrb[18].mxu0 %vm1172_vm1, %v959_v17  ;;  %v1061_v17 = vcombine.low %v1053_v12, %v1060_v6  ;;  %v1094_v23 = vrot.slane %v1080_v20, %v4361_v13  ;;  %v1112_v41 = vcombine.low %v1104_v37, %v1111_v38  ;;  %v776_v5 = vcombine.high %v774_v62, %v774_v62  ;;  %v3680_v6 = vld.sshfl [vmem:[%s4366_s9 + $0xe8] sm:$0x3 pattern:$0x76325410] }
  0x52   : > { %3854 = vmatprep.mubr.msk.f32.mxu0 %vm4217_vm0, %v4218_v7  ;;  %v1148_v1 = vcombine.low %v775_v63, %v774_v62  ;;  %vm1892_vm6 = vcmp.le.s32.totalorder %v4563_v25, 16 }
  0x53   : > { %v1095_v24 = vcombine.low %v1087_v22, %v1094_v23  ;;  %v1164_v9 = vcombine.low %v776_v5, %v3680_v6 }
  0x54   : > { %v1162_v3 = vrot.slane %v1148_v1, %v4361_v13 }
  0x55   : > { %3855 = vmatmul.mubr.msk.f32.gmra.mrb[20].mxu0 %vm1172_vm1, %v976_v35  ;;  %v726_v35 = vrot.slane %v339_v29, %v4361_v13  ;;  %v1171_v10 = vrot.slane %v1164_v9, %v4361_v13 }
  0x56   : > { %3857 = vmatprep.mubr.msk.f32.mxu0 %vm4217_vm0, %v4218_v7 }
  0x57   : > { %v734_v39 = vcombine.high %v726_v35, %v726_v35 }
  0x59   : > { %3858 = vmatmul.mubr.msk.f32.gmra.mrb[22].mxu0 %vm1172_vm1, %v993_v46  ;;  %v1113_v42 = vcombine.low %v726_v35, %v734_v39 }
  0x5a   : > { %3860 = vmatprep.mubr.msk.f32.mxu0 %vm4217_vm0, %v4218_v7 }
  0x5b   : > { %v1121_v44 = vrot.slane %v1113_v42, %v4361_v13 }
  0x5d   : > { %3861 = vmatmul.mubr.msk.f32.gmra.mrb[24].mxu0 %vm1172_vm1, %v1010_v52  ;;  %v1129_v46 = vcombine.low %v1121_v44, %v1128_v45  ;;  %v758_v52 = vcombine.high %v750_v49, %v750_v49 }
  0x5e   : > { %3863 = vmatprep.mubr.msk.f32.mxu0 %vm4217_vm0, %v4218_v7 }
  0x5f   : > { %v1131_v54 = vcombine.low %v758_v52, %v757_v51 }
  0x61   : > { %3864 = vmatmul.mubr.msk.f32.gmra.mrb[26].mxu0 %vm1172_vm1, %v1027_v61  ;;  %v1145_v56 = vrot.slane %v1131_v54, %v4361_v13  ;;  %v759_v61 = vcombine.high %v757_v51, %v757_v51 }
  0x62   : > { %3866 = vmatprep.mubr.msk.f32.mxu0 %vm4217_vm0, %v4218_v7 }
  0x63   : > { %v1146_v57 = vcombine.low %v1138_v55, %v1145_v56  ;;  %v1147_v0 = vcombine.low %v759_v61, %v767_v60 }
  0x65   : > { %3867 = vmatmul.mubr.msk.f32.gmra.mrb[28].mxu0 %vm1172_vm1, %v1044_v11  ;;  %v1155_v2 = vrot.slane %v1147_v0, %v4361_v13  ;;  %v4553_v11 = vld [vmem:[%s5694_s2] ss:$0 sm:$0xff] }
  0x66   : > { %3869 = vmatprep.mubr.msk.f32.mxu0 %vm4217_vm0, %v4218_v7 }
  0x67   : > { %v1163_v4 = vcombine.low %v1155_v2, %v1162_v3 }
  0x69   : > { %3870 = vmatmul.mubr.msk.f32.gmra.mrb[30].mxu0 %vm1172_vm1, %v1061_v17 }
  0x6a   : > { %3872 = vmatprep.mubr.msk.f32.mxu0 %vm4217_vm0, %v4218_v7 }
  0x6d   : > { %3873 = vmatmul.mubr.msk.f32.gmra.mrb[32].mxu0 %vm1172_vm1, %v1078_v21  ;;  %v4559_v21 = vstv %s3677_s16  ;;  %s5737_s16 = smov 24  }
  0x6e   : > { %3875 = vmatprep.mubr.msk.f32.mxu0 %vm4217_vm0, %v4218_v7  ;;  %vm1827_vm2 = vcmp.ge.s32.totalorder %v4559_v21, 1  ;;  %vm1837_vm3 = vcmp.le.s32.totalorder %v4559_v21, 16  ;;  %v4576_v37 = vadd.s32 1, %v4559_v21 }
  0x6f   : > { %vm4571_vm5 = vmand %vm1827_vm2, %vm1837_vm3 }
  0x70   : > { %vm4587_vm7 = vmand %vm4571_vm5, %vm1857_vm4  ;;  %vm1828_vm11 = vcmp.ge.s32.totalorder %v4576_v37, 1  ;;  %vm1838_vm12 = vcmp.le.s32.totalorder %v4576_v37, 16 }
  0x71   : > { %3876 = vmatmul.mubr.msk.f32.gmra.mrb[34].mxu0 %vm1172_vm1, %v1095_v24  ;;  %vm1895_vm8 = vmand %vm4571_vm5, %vm1892_vm6 }
  0x72   : > { %3878 = vmatprep.mubr.msk.f32.mxu0 %vm4217_vm0, %v4218_v7  ;;  %vm4632_vm13 = vmand %vm1828_vm11, %vm1838_vm12 }
  0x73   : > { %vm4647_vm14 = vmand %vm4632_vm13, %vm1857_vm4 }
  0x74   : > { %vm1898_vm15 = vmand %vm4632_vm13, %vm1892_vm6 }
  0x75   : > { %3879 = vmatmul.mubr.msk.f32.gmra.mrb[36].mxu0 %vm1172_vm1, %v1112_v41 }
  0x76   : > { %3881 = vmatprep.mubr.msk.f32.mxu0 %vm4217_vm0, %v4218_v7 }
  0x79   : > { %3882 = vmatmul.mubr.msk.f32.gmra.mrb[38].mxu0 %vm1172_vm1, %v1129_v46 }
  0x7a   : > { %3884 = vmatprep.mubr.msk.f32.mxu0 %vm4217_vm0, %v4218_v7 }
  0x7d   : > { %3885 = vmatmul.mubr.msk.f32.gmra.mrb[40].mxu0 %vm1172_vm1, %v1146_v57 }
  0x7e   : > { %3887 = vmatprep.mubr.msk.f32.mxu0 %vm4217_vm0, %v4218_v7 }
  0x81   : > { %3888 = vmatmul.mubr.msk.f32.gmra.mrb[42].mxu0 %vm1172_vm1, %v1163_v4 }
  0x82   : > { %3890 = vmatprep.mubr.msk.f32.mxu0 %vm4217_vm0, %v4218_v7 }
  0x85   : > { %3891 = vmatmul.mubr.msk.f32.gmra.mrb[44].mxu0 %vm1172_vm1, %v1171_v10 }
 0x100   : > { %v1285_v12 = vpop.f32.mrb[0].mxu0 }
 0x101   : > { %v1286_v14 = vadd.f32 %v4553_v11, %v1285_v12  ;;  %v3826_v15 = vpop.f32.mrb[1].mxu0 }
 0x103   : > { %v1399_v16 = vmax.f32 %v1286_v14, 0.0 }
 0x104   : > { %v1290_v17 = vpop.f32.mrb[2].mxu0 }
 0x105   : > { %v1445_v18 = vcombine.high %v1399_v16, %v1399_v16  ;;  %v1452_v19 = vrot.slane %v1399_v16, %v4361_v13  ;;  %v1291_v7 = vadd.f32 %v4553_v11, %v1290_v17  ;;  %v3829_v20 = vpop.f32.mrb[3].mxu0 }
 0x107   : > { %v1459_v22 = vrot.slane %v1445_v18, %v4361_v13  ;;  %v1460_v23 = vcombine.high %v1452_v19, %v1452_v19  ;;  %v1400_v24 = vmax.f32 %v1291_v7, 0.0 }
 0x108   : > { %v1295_v26 = vpop.f32.mrb[4].mxu0 }
 0x109   : > { %v1461_v27 = vcombine.high %v1459_v22, %v1459_v22  ;;  %v1923_v28 = vcombine.low %v1452_v19, %v1460_v23  ;;  %v1462_v29 = vcombine.high %v1400_v24, %v1400_v24  ;;  %v1469_v30 = vrot.slane %v1400_v24, %v4361_v13  ;;  %v3832_v31 = vpop.f32.mrb[5].mxu0 }
 0x10a   : > { %v1296_v32 = vadd.f32 %v4553_v11, %v1295_v26 }
 0x10b   : > { %v1924_v33 = vcombine.low %v1459_v22, %v1461_v27  ;;  %v1476_v34 = vrot.slane %v1462_v29, %v4361_v13  ;;  %v1477_v35 = vcombine.high %v1469_v30, %v1469_v30  ;;  %v1931_v38 = vrot.slane %v1923_v28, %v4361_v13 }
 0x10c   : > { %v1401_v39 = vmax.f32 %v1296_v32, 0.0  ;;  %v1300_v40 = vpop.f32.mrb[6].mxu0 }
 0x10d   : > { %v1938_v41 = vrot.slane %v1924_v33, %v4361_v13  ;;  %v1478_v42 = vcombine.high %v1476_v34, %v1476_v34  ;;  %v1940_v43 = vcombine.low %v1469_v30, %v1477_v35  ;;  %v1301_v44 = vadd.f32 %v4553_v11, %v1300_v40  ;;  %v3835_v45 = vpop.f32.mrb[7].mxu0 }
 0x10e   : > { %v1479_v46 = vcombine.high %v1401_v39, %v1401_v39  ;;  %v1486_v47 = vrot.slane %v1401_v39, %v4361_v13 }
 0x10f   : > { %v1939_v49 = vcombine.low %v1931_v38, %v1938_v41  ;;  %v1941_v50 = vcombine.low %v1476_v34, %v1478_v42  ;;  %v1402_v51 = vmax.f32 %v1301_v44, 0.0  ;;  %v1948_v52 = vrot.slane %v1940_v43, %v4361_v13 }
 0x110   : > { %v1493_v53 = vrot.slane %v1479_v46, %v4361_v13  ;;  %v1494_v54 = vcombine.high %v1486_v47, %v1486_v47  ;;  %v1963_v55 = vrot.slane %v1486_v47, %v4361_v13  ;;  %v1305_v56 = vpop.f32.mrb[8].mxu0 }
 0x111   : > { %v1955_v57 = vrot.slane %v1941_v50, %v4361_v13  ;;  %v1496_v58 = vcombine.high %v1402_v51, %v1402_v51  ;;  %v1503_v59 = vrot.slane %v1402_v51, %v4361_v13  ;;  %v1306_v60 = vadd.f32 %v4553_v11, %v1305_v56  ;;  %v3838_v61 = vpop.f32.mrb[9].mxu0 }
 0x112   : > { %v4602_v62 = vsel %vm1895_vm8, %v1963_v55, 0.0  ;;  %v1495_v63 = vcombine.high %v1493_v53, %v1493_v53  ;;  %v4606_v0 = vsel %vm4587_vm7, %v1939_v49, 0.0  ;;  %v1964_v5 = vcombine.low %v1494_v54, %v1493_v53 }
 0x113   : > { %v1956_v1 = vcombine.low %v1948_v52, %v1955_v57  ;;  %v1510_v2 = vrot.slane %v1496_v58, %v4361_v13  ;;  %v1511_v3 = vcombine.high %v1503_v59, %v1503_v59  ;;  %v1403_v4 = vmax.f32 %v1306_v60, 0.0 }
 0x114   : > { %v1965_v6 = vcombine.low %v1495_v63, %v1503_v59  ;;  %v1310_v9 = vpop.f32.mrb[10].mxu0  ;;  %v2459_v10 = vrot.slane %v4606_v0, 2  ;;  %v2418_v12 = vrot.slane %v4606_v0, 1  ;;  %v2462_v22 = vrot.slane %v4602_v62, 2 }
 0x115   : > { %v1981_v14 = vcombine.low %v1511_v3, %v1510_v2  ;;  %v1512_v15 = vcombine.high %v1510_v2, %v1510_v2  ;;  %v1513_v16 = vcombine.high %v1403_v4, %v1403_v4  ;;  %v1520_v17 = vrot.slane %v1403_v4, %v4361_v13  ;;  %v3841_v18 = vpop.f32.mrb[11].mxu0 }
 0x116   : > { %v1979_v19 = vrot.slane %v1965_v6, %v4361_v13  ;;  %v1311_v7 = vadd.f32 %v4553_v11, %v1310_v9  ;;  %v4617_v20 = vsel %vm4571_vm5, %v1956_v1, 0.0  ;;  %v1972_v31 = vrot.slane %v1964_v5, %v4361_v13 }
 0x117   : > { %v1527_v23 = vrot.slane %v1513_v16, %v4361_v13  ;;  %v1528_v24 = vcombine.high %v1520_v17, %v1520_v17  ;;  %v1982_v26 = vcombine.low %v1512_v15, %v1520_v17  ;;  %v2460_v27 = vrot.slane %v4617_v20, 2 }
 0x118   : > { %v1404_v28 = vmax.f32 %v1311_v7, 0.0  ;;  %v1315_v29 = vpop.f32.mrb[12].mxu0  ;;  %v2419_v30 = vrot.slane %v4617_v20, 1  ;;  %v1989_v32 = vrot.slane %v1981_v14, %v4361_v13  ;;  %v2421_v36 = vrot.slane %v4602_v62, 1 }
 0x119   : > { %v1529_v33 = vcombine.high %v1527_v23, %v1527_v23  ;;  %v1996_v34 = vrot.slane %v1982_v26, %v4361_v13  ;;  %v1316_v35 = vadd.f32 %v4553_v11, %v1315_v29  ;;  %v3844_v39 = vpop.f32.mrb[13].mxu0  ;;  %v2461_v42 = vsel %vm5714_vm9, %v2459_v10, %v2460_v27 }
 0x11a   : > { %v1530_v40 = vcombine.high %v1404_v28, %v1404_v28  ;;  %v1537_v41 = vrot.slane %v1404_v28, %v4361_v13  ;;  %v2420_v43 = vsel %vm2417_vm10, %v2418_v12, %v2419_v30  ;;  %v2004_v44 = vrot.slane %v1528_v24, %v4361_v13  ;;  %2573 = vrot.lane.b32.xlu1 %v2461_v42, %s5710_s17 }
 0x11b   : > { %v2005_v45 = vcombine.low %v1527_v23, %v1529_v33  ;;  %v1405_v46 = vmax.f32 %v1316_v35, 0.0  ;;  %2525 = vrot.lane.b32.xlu0 %v2420_v43, %s5708_s18  ;;  %v1980_v49 = vcombine.low %v1972_v31, %v1979_v19  ;;  %v1997_v50 = vcombine.low %v1989_v32, %v1996_v34 }
 0x11c   : > { %v1544_v37 = vrot.slane %v1530_v40, %v4361_v13  ;;  %v1545_v47 = vcombine.high %v1537_v41, %v1537_v41  ;;  %v1320_v51 = vpop.f32.mrb[14].mxu0  ;;  %v2463_v54 = vsel %vm5714_vm9, %v2460_v27, %v2462_v22  ;;  %v2422_v59 = vsel %vm2417_vm10, %v2419_v30, %v2421_v36 }
 0x11d   : > { %v1547_v52 = vcombine.high %v1405_v46, %v1405_v46  ;;  %v1554_v53 = vrot.slane %v1405_v46, %v4361_v13  ;;  %v1321_v55 = vadd.f32 %v4553_v11, %v1320_v51  ;;  %v3847_v56 = vpop.f32.mrb[15].mxu0  ;;  %v4657_v60 = vsel %vm4632_vm13, %v1997_v50, 0.0 }
 0x11e   : > { %v1546_v57 = vcombine.high %v1544_v37, %v1544_v37  ;;  %v2006_v58 = vcombine.low %v1537_v41, %v1545_v47  ;;  %v2013_v61 = vrot.slane %v2005_v45, %v4361_v13  ;;  %2575 = vrot.lane.b32.xlu1 %v2463_v54, %s5710_s17  ;;  %v4667_v1 = vsel %vm4647_vm14, %v1980_v49, 0.0 }
 0x11f   : > { %v4661_v62 = vrot.slane %v1547_v52, %v4361_v13  ;;  %v1562_v63 = vcombine.high %v1554_v53, %v1554_v53  ;;  %2527 = vrot.lane.b32.xlu0 %v2422_v59, %s5708_s18  ;;  %v1406_v4 = vmax.f32 %v1321_v55, 0.0  ;;  %v2424_v9 = vrot.slane %v4657_v60, 1 }
 0x120   : > { %v2020_v2 = vrot.slane %v2006_v58, %v4361_v13  ;;  %v2022_v3 = vcombine.low %v1544_v37, %v1546_v57  ;;  %v1325_v5 = vpop.f32.mrb[16].mxu0  ;;  %v2423_v15 = vrot.slane %v4667_v1, 1  ;;  %v2368_v19 = vsel %vm1898_vm15, %v2004_v44, 0.0 }
 0x121   : > { %v2023_v6 = vcombine.low %v1554_v53, %v1562_v63  ;;  %v1563_v10 = vcombine.high %v4661_v62, %v4661_v62  ;;  %v3850_v12 = vpop.f32.mrb[17].mxu0  ;;  %v1564_v16 = vcombine.high %v1406_v4, %v1406_v4  ;;  %v1571_v17 = vrot.slane %v1406_v4, %v4361_v13 }
 0x122   : > { %v2030_v14 = vrot.slane %v2022_v3, %v4361_v13  ;;  %2623 = vrot.lane.b32.xlu1 %v4657_v60, %s5702_s20  ;;  %v1326_v7 = vadd.f32 %v4553_v11, %v1325_v5  ;;  %v2021_v22 = vcombine.low %v2013_v61, %v2020_v2  ;;  %v299_v27 = vadd.s32 2, %v4559_v21 }
 0x123   : > { %v2037_v18 = vrot.slane %v2023_v6, %v4361_v13  ;;  %2621 = vrot.lane.b32.xlu0 %v4667_v1, %s5702_s20  ;;  %v1578_v23 = vrot.slane %v1564_v16, %v4361_v13  ;;  %v1579_v24 = vcombine.high %v1571_v17, %v1571_v17  ;;  %v2046_v26 = vcombine.low %v1563_v10, %v1571_v17 }
 0x124   : > { %v4688_v28 = vpop.f32.mrb[18].mxu0  ;;  %v2425_v29 = vsel %vm2417_vm10, %v2423_v15, %v2424_v9  ;;  %v2465_v30 = vrot.slane %v4657_v60, 2  ;;  %v2426_v31 = vrot.slane %v2368_v19, 1  ;;  %v1407_v32 = vmax.f32 %v1326_v7, 0.0 }
 0x125   : > { %v3853_v33 = vpop.f32.mrb[19].mxu0  ;;  %v2047_v34 = vcombine.low %v1579_v24, %v1578_v23  ;;  %v2054_v35 = vrot.slane %v2046_v26, %v4361_v13  ;;  %v1580_v36 = vcombine.high %v1578_v23, %v1578_v23  ;;  %v2038_v38 = vcombine.low %v2030_v14, %v2037_v18 }
 0x126   : > { %2529 = vrot.lane.b32.xlu1 %v2425_v29, %s5708_s18  ;;  %v1581_v39 = vcombine.high %v1407_v32, %v1407_v32  ;;  %v1588_v40 = vrot.slane %v1407_v32, %v4361_v13  ;;  %v2464_v42 = vrot.slane %v4667_v1, 2  ;;  %vm1829_vm0 = vcmp.ge.s32.totalorder %v299_v27, 1 }
 0x127   : > { %2669 = vrot.lane.b32.xlu0 %v2425_v29, %s5706_s21  ;;  %v2061_v41 = vrot.slane %v2047_v34, %v4361_v13  ;;  %vm1839_vm2 = vcmp.le.s32.totalorder %v299_v27, 16  ;;  %v2427_v48 = vsel %vm2417_vm10, %v2424_v9, %v2426_v31  ;;  %v2467_v56 = vrot.slane %v2368_v19, 2 }
 0x128   : > { %v4698_v43 = vpop.f32.mrb[20].mxu0  ;;  %v4701_v44 = vrot.slane %v1581_v39, %v4361_v13  ;;  %v1596_v45 = vcombine.high %v1588_v40, %v1588_v40  ;;  %v2063_v46 = vcombine.low %v1580_v36, %v1588_v40  ;;  %v2466_v47 = vsel %vm5714_vm9, %v2464_v42, %v2465_v30  ;;  %vm4712_vm3 = vmand %vm1829_vm0, %vm1839_vm2 }
 0x129   : > { %v3856_v37 = vpop.f32.mrb[21].mxu0  ;;  %v4705_v49 = vcombine.low %v2054_v35, %v2061_v41  ;;  %vm1866_vm5 = vmand %vm4712_vm3, %vm1857_vm4  ;;  %v2468_v2 = vsel %vm5714_vm9, %v2465_v30, %v2467_v56  ;;  %v4734_v4 = vsel %vm4712_vm3, %v2038_v38, 0.0  ;;  %v2045_v16 = vrot.slane %v4661_v62, %v4361_v13 }
 0x12a   : > { %2717 = vrot.lane.b32.xlu1 %v2466_v47, %s5712_s22  ;;  %v2064_v50 = vcombine.low %v1596_v45, %v4701_v44  ;;  %v2071_v51 = vrot.slane %v2063_v46, %v4361_v13  ;;  %v4727_v3 = vsel %vm1866_vm5, %v2021_v22, 0.0  ;;  %v2429_v12 = vrot.slane %v4734_v4, 1  ;;  %vm1901_vm7 = vmand %vm4712_vm3, %vm1892_vm6 }
 0x12b   : > { %2671 = vrot.lane.b32.xlu0 %v2427_v48, %s5706_s21  ;;  %v2428_v18 = vrot.slane %v4727_v3, 1  ;;  %v2371_v30 = vsel %vm1901_vm7, %v2045_v16, 0.0  ;;  %v2470_v42 = vrot.slane %v4734_v4, 2 }
 0x12c   : > { %v1340_v53 = vpop.f32.mrb[22].mxu0  ;;  %v2078_v54 = vrot.slane %v2064_v50, %v4361_v13  ;;  %v2431_v45 = vrot.slane %v2371_v30, 1  ;;  %v2469_v50 = vrot.slane %v4727_v3, 2 }
 0x12d   : > { %v3859_v55 = vpop.f32.mrb[23].mxu0  ;;  %v1341_v58 = vadd.f32 %v4553_v11, %v1340_v53  ;;  %v2430_v26 = vsel %vm2417_vm10, %v2428_v18, %v2429_v12 }
 0x12e   : > { %2577 = vrot.lane.b32.xlu1 %v2466_v47, %s5710_s17  ;;  %v4723_v57 = vcombine.low %v2071_v51, %v2078_v54 }
 0x12f   : > { %2531 = vrot.lane.b32.xlu0 %v2427_v48, %s5708_s18  ;;  %v1410_v61 = vmax.f32 %v1341_v58, 0.0 }
 0x130   : > { %v1345_v59 = vpop.f32.mrb[24].mxu0 }
 0x131   : > { %v3862_v63 = vpop.f32.mrb[25].mxu0  ;;  %v1632_v5 = vcombine.high %v1410_v61, %v1410_v61  ;;  %v1346_v6 = vadd.f32 %v4553_v11, %v1345_v59  ;;  %v4739_v14 = vrot.slane %v1410_v61, %v4361_v13  ;;  %v2471_v61 = vsel %vm5714_vm9, %v2469_v50, %v2470_v42 }
 0x132   : > { %2765 = vrot.lane.b32.xlu1 %v4727_v3, %s5704_s23  ;;  %v2432_v63 = vsel %vm2417_vm10, %v2429_v12, %v2431_v45  ;;  %v1331_v50 = vadd.f32 %v4553_v11, %v4688_v28 }
 0x133   : > { %2719 = vrot.lane.b32.xlu0 %v2468_v2, %s5712_s22  ;;  %v1646_v15 = vrot.slane %v1632_v5, %v4361_v13  ;;  %v1411_v17 = vmax.f32 %v1346_v6, 0.0  ;;  %v1647_v19 = vcombine.high %v4739_v14, %v4739_v14  ;;  %s5736_s22 = smov 48  }
 0x134   : > { %v1350_v9 = vpop.f32.mrb[26].mxu0 }
 0x135   : > { %v3865_v10 = vpop.f32.mrb[27].mxu0  ;;  %v1648_v7 = vcombine.high %v1646_v15, %v1646_v15  ;;  %v1351_v22 = vadd.f32 %v4553_v11, %v1350_v9  ;;  %v1649_v23 = vcombine.high %v1411_v17, %v1411_v17  ;;  %v1656_v27 = vrot.slane %v1411_v17, %v4361_v13 }
 0x136   : > { %2625 = vrot.lane.b32.xlu1 %v4727_v3, %s5702_s20  ;;  %v2128_v33 = vcombine.low %v1647_v19, %v1646_v15  ;;  %v300_v10 = vadd.s32 3, %v4559_v21  ;;  %v2472_v19 = vrot.slane %v2371_v30, 2  ;;  %v3045_v30 = vld [vmem:[%s5695_s3 + $0x8] sm:$0xff] }
 0x137   : > { %2579 = vrot.lane.b32.xlu0 %v2468_v2, %s5710_s17  ;;  %v1412_v29 = vmax.f32 %v1351_v22, 0.0  ;;  %v1663_v31 = vrot.slane %v1649_v23, %v4361_v13  ;;  %v1664_v34 = vcombine.high %v1656_v27, %v1656_v27  ;;  %v2129_v35 = vcombine.low %v1648_v7, %v1656_v27  ;;  %s5739_s17 = smov 32  }
 0x138   : > { %v1355_v62 = vpop.f32.mrb[28].mxu0  ;;  %v2136_v51 = vrot.slane %v2128_v33, %v4361_v13  ;;  %vm1830_vm8 = vcmp.ge.s32.totalorder %v300_v10, 1  ;;  %vm1840_vm11 = vcmp.le.s32.totalorder %v300_v10, 16 }
 0x139   : > { %v3868_v24 = vpop.f32.mrb[29].mxu0  ;;  %v1356_v32 = vadd.f32 %v4553_v11, %v1355_v62  ;;  %v1666_v36 = vcombine.high %v1412_v29, %v1412_v29  ;;  %v1665_v39 = vcombine.high %v1663_v31, %v1663_v31  ;;  %v4763_v40 = vrot.slane %v1412_v29, %v4361_v13  ;;  %v3044_v29 = vld [vmem:[%s5695_s3] sm:$0xff]  ;;  %vm4814_vm12 = vmand %vm1830_vm8, %vm1840_vm11 }
 0x13a   : > { %2813 = vrot.lane.b32.xlu1 %v2430_v26, %s5700_s10  ;;  %v2145_v46 = vcombine.low %v1664_v34, %v1663_v31  ;;  %v2143_v52 = vrot.slane %v2129_v35, %v4361_v13  ;;  %v3046_v34 = vld [vmem:[%s5695_s3 + $0x10] sm:$0xff]  ;;  %v3047_v35 = vld [vmem:[%s5695_s3 + $0x18] sm:$0xff]  ;;  %vm4826_vm13 = vmand %vm4814_vm12, %vm1857_vm4 }
 0x13b   : > { %2767 = vrot.lane.b32.xlu0 %v4734_v4, %s5704_s23  ;;  %v1680_v37 = vrot.slane %v1666_v36, %v4361_v13  ;;  %v2146_v47 = vcombine.low %v1665_v39, %v4763_v40  ;;  %v1413_v48 = vmax.f32 %v1356_v32, 0.0  ;;  %s5734_s23 = smov 16   ;;  %vm1904_vm14 = vmand %vm4814_vm12, %vm1892_vm6 }
 0x13c   : > { %v1360_v38 = vpop.f32.mrb[30].mxu0  ;;  %v2153_v53 = vrot.slane %v2145_v46, %v4361_v13  ;;  %v4784_v15 = vcombine.low %v2136_v51, %v2143_v52 }
 0x13d   : > { %v3871_v41 = vpop.f32.mrb[31].mxu0  ;;  %v2160_v55 = vrot.slane %v2146_v47, %v4361_v13  ;;  %v1683_v56 = vcombine.high %v1413_v48, %v1413_v48  ;;  %v1690_v58 = vrot.slane %v1413_v48, %v4361_v13  ;;  %v1682_v2 = vcombine.high %v1680_v37, %v1680_v37 }
 0x13e   : > { %2673 = vrot.lane.b32.xlu1 %v2430_v26, %s5706_s21  ;;  %v1361_v9 = vadd.f32 %v4553_v11, %v1360_v38  ;;  %v3971_v47 = vpack.c.bf16 %v3047_v35, %v3046_v34 }
 0x13f   : > { %2627 = vrot.lane.b32.xlu0 %v4734_v4, %s5702_s20  ;;  %v1697_v5 = vrot.slane %v1683_v56, %v4361_v13  ;;  %v1698_v6 = vcombine.high %v1690_v58, %v1690_v58  ;;  %v4786_v16 = vcombine.low %v2153_v53, %v2160_v55  ;;  %v2169_v7 = vcombine.low %v1680_v37, %v1682_v2  ;;  %s5729_s20 = smov 40   ;;  %v3049_v55 = vld [vmem:[%s5695_s3 + $0x28] sm:$0xff] }
 0x140   : > { %v1365_v54 = vpop.f32.mrb[32].mxu0  ;;  %v1414_v18 = vmax.f32 %v1361_v9, 0.0  ;;  %v3967_v37 = vpack.c.bf16 %v3045_v30, %v3044_v29  ;;  %v1597_v9 = vcombine.high %v4701_v44, %v4701_v44  ;;  %v3050_v44 = vld [vmem:[%s5695_s3 + $0x30] sm:$0xff] }
 0x141   : > { %v3874_v59 = vpop.f32.mrb[33].mxu0  ;;  %v1699_v22 = vcombine.high %v1697_v5, %v1697_v5  ;;  %v2170_v62 = vcombine.low %v1690_v58, %v1698_v6  ;;  %v2177_v31 = vrot.slane %v2169_v7, %v4361_v13  ;;  %v1366_v33 = vadd.f32 %v4553_v11, %v1365_v54  ;;  %v3048_v54 = vld [vmem:[%s5695_s3 + $0x20] sm:$0xff] }
 0x142   : > { %2861 = vrot.lane.b32.xlu1 %v2471_v61, %s4227_s13  ;;  %v1700_v23 = vcombine.high %v1414_v18, %v1414_v18  ;;  %v1707_v24 = vrot.slane %v1414_v18, %v4361_v13  ;;  %3968 = vmatprep.subr.bf16.mxu1 %v3967_v37  ;;  %v3975_v10 = vpack.c.bf16 %v3049_v55, %v3048_v54 }
 0x143   : > { %2815 = vrot.lane.b32.xlu0 %v2432_v63, %s5700_s10  ;;  %v2184_v38 = vrot.slane %v2170_v62, %v4361_v13  ;;  %v2186_v39 = vcombine.low %v1697_v5, %v1699_v22  ;;  %v1415_v45 = vmax.f32 %v1366_v33, 0.0  ;;  %s5735_s10 = smov 8   ;;  %3970 = vmatpush3.bf16.msra.mxu1 %v3967_v37  ;;  %v1408_v33 = vmax.f32 %v1331_v50, 0.0 }
 0x144   : > { %v1370_v17 = vpop.f32.mrb[34].mxu0  ;;  %v4792_v27 = vrot.slane %v1700_v23, %v4361_v13  ;;  %v1715_v32 = vcombine.high %v1707_v24, %v1707_v24  ;;  %3972 = vmatprep.subr.bf16.mxu1 %v3971_v47  ;;  %v2086_v34 = vrot.slane %v1597_v9, %v4361_v13 }
 0x145   : > { %v3877_v12 = vpop.f32.mrb[35].mxu0  ;;  %v1371_v46 = vadd.f32 %v4553_v11, %v1370_v17  ;;  %v1717_v51 = vcombine.high %v1415_v45, %v1415_v45  ;;  %v1724_v52 = vrot.slane %v1415_v45, %v4361_v13  ;;  %v2194_v56 = vrot.slane %v2186_v39, %v4361_v13  ;;  %v3052_v45 = vld [vmem:[%s5695_s3 + $0x40] sm:$0xff] }
 0x146   : > { %2675 = vrot.lane.b32.xlu1 %v2432_v63, %s5706_s21  ;;  %v1716_v41 = vcombine.high %v4792_v27, %v4792_v27  ;;  %v4843_v58 = vcombine.low %v2177_v31, %v2184_v38  ;;  %v1336_v17 = vadd.f32 %v4553_v11, %v4698_v43  ;;  %v4872_v43 = vsel %vm4814_vm12, %v4723_v57, 0.0  ;;  %s5738_s21 = smov 56  }
 0x147   : > { %2533 = vrot.lane.b32.xlu0 %v2430_v26, %s5708_s18  ;;  %v4801_v26 = vsel %vm5714_vm9, %v2470_v42, %v2472_v19  ;;  %v2187_v42 = vcombine.low %v1707_v24, %v1715_v32  ;;  %v1416_v53 = vmax.f32 %v1371_v46, 0.0  ;;  %v1731_v59 = vrot.slane %v1717_v51, %v4361_v13  ;;  %3974 = vmatpush3.bf16.msra.mxu1 %v3971_v47 }
 0x148   : > { %v1732_v2 = vcombine.high %v1724_v52, %v1724_v52  ;;  %v2210_v5 = vcombine.low %v1716_v41, %v1724_v52  ;;  %3976 = vmatprep.subr.bf16.mxu1 %v3975_v10  ;;  %v2434_v32 = vrot.slane %v4872_v43, 1  ;;  %v1409_v35 = vmax.f32 %v1336_v17, 0.0  ;;  %v1375_v36 = vpop.f32.mrb[36].mxu0 }
 0x149   : > { %v2201_v28 = vrot.slane %v2187_v42, %v4361_v13  ;;  %v1734_v6 = vcombine.high %v1416_v53, %v1416_v53  ;;  %v1733_v12 = vcombine.high %v1731_v59, %v1731_v59  ;;  %v2374_v37 = vsel %vm1904_vm14, %v2086_v34, 0.0  ;;  %v3880_v51 = vpop.f32.mrb[37].mxu0 }
 0x14a   : > { %2863 = vrot.lane.b32.xlu1 %v4801_v26, %s4227_s13  ;;  %v2211_v18 = vcombine.low %v1732_v2, %v1731_v59  ;;  %v2218_v7 = vrot.slane %v2210_v5, %v4361_v13  ;;  %v1615_v46 = vcombine.high %v1409_v35, %v1409_v35  ;;  %v1605_v47 = vrot.slane %v1408_v33, %v4361_v13 }
 0x14b   : > { %2721 = vrot.lane.b32.xlu0 %v2471_v61, %s5729_s20  ;;  %v4857_v19 = vrot.slane %v1734_v6, %v4361_v13  ;;  %v4875_v62 = vcombine.low %v2194_v56, %v2201_v28  ;;  %3978 = vmatpush3.bf16.msra.mxu1 %v3975_v10  ;;  %v1376_v50 = vadd.f32 %v4553_v11, %v1375_v36  ;;  %v2475_v54 = vrot.slane %v4872_v43, 2 }
 0x14c   : > { %v2225_v23 = vrot.slane %v2211_v18, %v4361_v13  ;;  %v2436_v55 = vrot.slane %v2374_v37, 1  ;;  %v1380_v56 = vpop.f32.mrb[38].mxu0  ;;  %v1629_v28 = vrot.slane %v1615_v46, %v4361_v13  ;;  %v1613_v6 = vcombine.high %v1605_v47, %v1605_v47 }
 0x14d   : > { %v1417_v59 = vmax.f32 %v1376_v50, 0.0  ;;  %v1381_v2 = vadd.f32 %v4553_v11, %v1380_v56  ;;  %v3883_v5 = vpop.f32.mrb[39].mxu0 }
 0x14e   : > { %2581 = vrot.lane.b32.xlu1 %v2471_v61, %s5734_s23  ;;  %v4851_v61 = vsel %vm4826_vm13, %v4705_v49, 0.0  ;;  %v3051_v49 = vld [vmem:[%s5695_s3 + $0x38] sm:$0xff]  ;;  %v4888_v39 = vcombine.low %v2218_v7, %v2225_v23 }
 0x14f   : > { %2535 = vrot.lane.b32.xlu0 %v2432_v63, %s5735_s10  ;;  %v1741_v63 = vrot.slane %v1416_v53, %v4361_v13  ;;  %v3979_v30 = vpack.c.bf16 %v3051_v49, %v3050_v44  ;;  %v2433_v31 = vrot.slane %v4851_v61, 1  ;;  %v2474_v48 = vrot.slane %v4851_v61, 2 }
 0x150   : > { %v1622_v53 = vrot.slane %v1409_v35, %v4361_v13  ;;  %v1751_v9 = vcombine.high %v1417_v59, %v1417_v59  ;;  %v1418_v10 = vmax.f32 %v1381_v2, 0.0  ;;  %v2437_v44 = vsel %vm2417_vm10, %v2434_v32, %v2436_v55 }
 0x151   : > { %v1749_v22 = vcombine.high %v1741_v63, %v1741_v63  ;;  %v2227_v24 = vcombine.low %v1733_v12, %v1741_v63  ;;  %3980 = vmatprep.subr.bf16.mxu1 %v3979_v30  ;;  %v2435_v42 = vsel %vm2417_vm10, %v2433_v31, %v2434_v32  ;;  %v1758_v63 = vrot.slane %v1417_v59, %v4361_v13 }
 0x152   : > { %2769 = vrot.lane.b32.xlu1 %v4851_v61, %s5736_s22  ;;  %3982 = vmatpush3.bf16.msra.mxu1 %v3979_v30  ;;  %v1630_v18 = vcombine.high %v1622_v53, %v1622_v53  ;;  %v2476_v12 = vsel %vm5714_vm9, %v2474_v48, %v2475_v54  ;;  %v1631_v49 = vcombine.high %v1629_v28, %v1629_v28  ;;  %v305_v2 = vadd.s32 8, %v4559_v21 }
 0x153   : > { %2723 = vrot.lane.b32.xlu0 %v4801_v26, %s5729_s20  ;;  %v2228_v29 = vcombine.low %v1749_v22, %v4857_v19  ;;  %v2235_v57 = vrot.slane %v2227_v24, %v4361_v13  ;;  %3909 = vmatprep.subr.mxu1 %v3052_v45  ;;  %v1765_v7 = vrot.slane %v1751_v9, %v4361_v13  ;;  %v2477_v24 = vrot.slane %v2374_v37, 2 }
 0x154   : > { %v1768_v22 = vcombine.high %v1418_v10, %v1418_v10  ;;  %v1775_v23 = vrot.slane %v1418_v10, %v4361_v13  ;;  %v1766_v30 = vcombine.high %v1758_v63, %v1758_v63  ;;  %v2104_v34 = vcombine.low %v1622_v53, %v1630_v18  ;;  %v1385_v53 = vpop.f32.mrb[40].mxu0 }
 0x155   : > { %v2242_v38 = vrot.slane %v2228_v29, %v4361_v13  ;;  %v301_v29 = vadd.s32 4, %v4559_v21  ;;  %v2105_v35 = vcombine.low %v1629_v28, %v1631_v49  ;;  %v2478_v48 = vsel %vm5714_vm9, %v2475_v54, %v2477_v24  ;;  %v3886_v54 = vpop.f32.mrb[41].mxu0 }
 0x156   : > { %2629 = vrot.lane.b32.xlu1 %v4851_v61, %s5737_s16  ;;  %3910 = vmatpush3.msra.mxu1 %v3052_v45  ;;  %v1782_v31 = vrot.slane %v1768_v22, %v4361_v13  ;;  %v1783_v32 = vcombine.high %v1775_v23, %v1775_v23  ;;  %v2251_v45 = vcombine.low %v1758_v63, %v1766_v30  ;;  %vm1835_vm5 = vcmp.ge.s32.totalorder %v305_v2, 1 }
 0x157   : > { %2583 = vrot.lane.b32.xlu0 %v4801_v26, %s5734_s23  ;;  %v4894_v41 = vcombine.low %v2235_v57, %v2242_v38  ;;  %v1598_v26 = vcombine.high %v1408_v33, %v1408_v33  ;;  %v2087_v33 = vcombine.low %v1605_v47, %v1613_v6  ;;  %v1767_v38 = vcombine.high %v1765_v7, %v1765_v7 }
 0x158   : > { %vm1831_vm15 = vcmp.ge.s32.totalorder %v301_v29, 1  ;;  %vm1841_vm0 = vcmp.le.s32.totalorder %v301_v29, 16  ;;  %v2268_v46 = vcombine.low %v1775_v23, %v1783_v32  ;;  %v2112_v47 = vrot.slane %v2104_v34, %v4361_v13 }
 0x159   : > { %v1612_v52 = vrot.slane %v1598_v26, %v4361_v13  ;;  %v1784_v26 = vcombine.high %v1782_v31, %v1782_v31  ;;  %v2095_v37 = vrot.slane %v2087_v33, %v4361_v13  ;;  %v2119_v50 = vrot.slane %v2105_v35, %v4361_v13  ;;  %vm4932_vm2 = vmand %vm1831_vm15, %vm1841_vm0 }
 0x15a   : > { %2817 = vrot.lane.b32.xlu1 %v2435_v42, %s5738_s21  ;;  %v2259_v55 = vrot.slane %v2251_v45, %v4361_v13  ;;  %v2276_v56 = vrot.slane %v2268_v46, %v4361_v13  ;;  %v1386_v28 = vadd.f32 %v4553_v11, %v1385_v53  ;;  %vm1872_vm3 = vmand %vm4932_vm2, %vm1857_vm4  ;;  %vm1845_vm7 = vcmp.le.s32.totalorder %v305_v2, 16 }
 0x15b   : > { %2771 = vrot.lane.b32.xlu0 %v4872_v43, %s5736_s22  ;;  %v1614_v17 = vcombine.high %v1612_v52, %v1612_v52  ;;  %v2269_v51 = vcombine.low %v1782_v31, %v1784_v26  ;;  %v2120_v5 = vcombine.low %v2112_v47, %v2119_v50  ;;  %vm4949_vm8 = vmand %vm1835_vm5, %vm1845_vm7  ;;  %v2127_v33 = vrot.slane %v4739_v14, %v4361_v13 }
 0x15c   : > { %v1419_v6 = vmax.f32 %v1386_v28, 0.0  ;;  %vm1884_vm11 = vmand %vm4949_vm8, %vm1857_vm4 }
 0x15d   : > { %v2088_v57 = vcombine.low %v1612_v52, %v1614_v17  ;;  %v2283_v63 = vrot.slane %v2269_v51, %v4361_v13  ;;  %vm1919_vm12 = vmand %vm4949_vm8, %vm1892_vm6 }
 0x15e   : > { %2677 = vrot.lane.b32.xlu1 %v2435_v42, %s5739_s17  ;;  %v1785_v10 = vcombine.high %v1419_v6, %v1419_v6  ;;  %v1792_v17 = vrot.slane %v1419_v6, %v4361_v13  ;;  %vm1907_vm13 = vmand %vm4932_vm2, %vm1892_vm6 }
 0x15f   : > { %2631 = vrot.lane.b32.xlu0 %v4872_v43, %s5737_s16  ;;  %v2102_v36 = vrot.slane %v2088_v57, %v4361_v13  ;;  %v1390_v57 = vpop.f32.mrb[42].mxu0  ;;  %v2377_v50 = vsel %vm1907_vm13, %v2127_v33, 0.0 }
 0x160   : > { %v1799_v22 = vrot.slane %v1785_v10, %v4361_v13  ;;  %v2291_v24 = vrot.slane %v1792_v17, %v4361_v13  ;;  %v1391_v14 = vadd.f32 %v4553_v11, %v1390_v57  ;;  %v3889_v26 = vpop.f32.mrb[43].mxu0 }
 0x161   : > { %v2103_v59 = vcombine.low %v2095_v37, %v2102_v36 }
 0x162   : > { %2865 = vrot.lane.b32.xlu1 %v2476_v12, %s4227_s13  ;;  %v1420_v37 = vmax.f32 %v1391_v14, 0.0  ;;  %v1801_v36 = vcombine.high %v1799_v22, %v1799_v22  ;;  %v2389_v47 = vsel %vm1919_vm12, %v2291_v24, 0.0  ;;  %v2482_v14 = vrot.slane %v2377_v50, 2 }
 0x163   : > { %2819 = vrot.lane.b32.xlu0 %v2437_v44, %s5738_s21  ;;  %v4953_v49 = vsel %vm1872_vm3, %v2103_v59, 0.0  ;;  %v2505_v51 = vrot.slane %v2389_v47, 1  ;;  %v2510_v52 = vrot.slane %v2389_v47, 2 }
 0x164   : > { %v2438_v35 = vrot.slane %v4953_v49, 1 }
 0x166   : > { %2679 = vrot.lane.b32.xlu1 %v2437_v44, %s5739_s17 }
 0x167   : > { %2537 = vrot.lane.b32.xlu0 %v2435_v42, %s5735_s10  ;;  %v2252_v42 = vcombine.low %v1765_v7, %v1767_v38  ;;  %v4964_v7 = vsel %vm4932_vm2, %v2120_v5, 0.0 }
 0x168   : > { %v2439_v38 = vrot.slane %v4964_v7, 1  ;;  %v2480_v18 = vrot.slane %v4964_v7, 2 }
 0x169   : > { %v2266_v9 = vrot.slane %v2252_v42, %v4361_v13  ;;  %v1395_v42 = vpop.f32.mrb[44].mxu0 }
 0x16a   : > { %2867 = vrot.lane.b32.xlu1 %v2478_v48, %s4227_s13  ;;  %v2440_v53 = vsel %vm2417_vm10, %v2438_v35, %v2439_v38  ;;  %v3892_v28 = vpop.f32.mrb[45].mxu0  ;;  %v306_v35 = vadd.s32 9, %v4559_v21  ;;  %v2483_v47 = vsel %vm5714_vm9, %v2480_v18, %v2482_v14 }
 0x16b   : > { %2725 = vrot.lane.b32.xlu0 %v2476_v12, %s5729_s20 }
 0x16c   : > { %vm1836_vm14 = vcmp.ge.s32.totalorder %v306_v35, 1  ;;  %vm1846_vm15 = vcmp.le.s32.totalorder %v306_v35, 16 }
 0x16d   : > { %vm5031_vm0 = vmand %vm1836_vm14, %vm1846_vm15  ;;  %vm2909_vm15 = vcmask 64512  }
 0x16e   : > { %2585 = vrot.lane.b32.xlu1 %v2476_v12, %s5734_s23  ;;  %v2267_v12 = vcombine.low %v2259_v55, %v2266_v9  ;;  %v1802_v55 = vcombine.high %v1420_v37, %v1420_v37  ;;  %v2441_v9 = vrot.slane %v2377_v50, 1  ;;  %vm1887_vm5 = vmand %vm5031_vm0, %vm1857_vm4 }
 0x16f   : > { %2539 = vrot.lane.b32.xlu0 %v2437_v44, %s5735_s10  ;;  %v2284_v44 = vcombine.low %v2276_v56, %v2283_v63  ;;  %v1396_v56 = vadd.f32 %v4553_v11, %v1395_v42  ;;  %v1800_v63 = vcombine.high %v1792_v17, %v1792_v17  ;;  %v2479_v11 = vrot.slane %v4953_v49, 2 }
 0x170   : > { %v4967_v23 = vsel %vm1884_vm11, %v2267_v12, 0.0  ;;  %v1816_v2 = vrot.slane %v1802_v55, %v4361_v13  ;;  %v2442_v17 = vsel %vm2417_vm10, %v2439_v38, %v2441_v9 }
 0x171   : > { %v2502_v29 = vrot.slane %v4967_v23, 1  ;;  %v2507_v30 = vrot.slane %v4967_v23, 2  ;;  %v4974_v31 = vsel %vm4949_vm8, %v2284_v44, 0.0  ;;  %v1421_v6 = vmax.f32 %v1396_v56, 0.0  ;;  %vm1922_vm8 = vmand %vm5031_vm0, %vm1892_vm6 }
 0x172   : > { %2773 = vrot.lane.b32.xlu1 %v4953_v49, %s5736_s22  ;;  %v2503_v34 = vrot.slane %v4974_v31, 1  ;;  %v2508_v32 = vrot.slane %v4974_v31, 2  ;;  %v1818_v12 = vcombine.high %v1816_v2, %v1816_v2  ;;  %v2481_v33 = vsel %vm5714_vm9, %v2479_v11, %v2480_v18 }
 0x173   : > { %2727 = vrot.lane.b32.xlu0 %v2478_v48, %s5729_s20  ;;  %v1825_v44 = vrot.slane %v1421_v6, %v4361_v13  ;;  %v303_v56 = vadd.s32 6, %v4559_v21 }
 0x174   : > { %v4995_v45 = vsel %vm2417_vm10, %v2502_v29, %v2503_v34  ;;  %v4998_v46 = vsel %vm5714_vm9, %v2507_v30, %v2508_v32  ;;  %v5007_v54 = vsel %vm2417_vm10, %v2503_v34, %v2505_v51  ;;  %v5010_v59 = vsel %vm5714_vm9, %v2508_v32, %v2510_v52 }
 0x175   : > { %v2310_v24 = vcombine.low %v1818_v12, %v1825_v44  ;;  %v2292_v29 = vcombine.low %v1800_v63, %v1799_v22  ;;  %v302_v32 = vadd.s32 5, %v4559_v21  ;;  %v1826_v50 = vcombine.high %v1825_v44, %v1825_v44 }
 0x176   : > { %2633 = vrot.lane.b32.xlu1 %v4953_v49, %s5737_s16  ;;  %vm1833_vm13 = vcmp.ge.s32.totalorder %v303_v56, 1  ;;  %vm1843_vm14 = vcmp.le.s32.totalorder %v303_v56, 16  ;;  %v2209_v56 = vrot.slane %v4792_v27, %v4361_v13 }
 0x177   : > { %2587 = vrot.lane.b32.xlu0 %v2478_v48, %s5734_s23  ;;  %v1809_v48 = vrot.slane %v1420_v37, %v4361_v13  ;;  %v2324_v34 = vrot.slane %v2310_v24, %v4361_v13  ;;  %v2300_v22 = vrot.slane %v2292_v29, %v4361_v13  ;;  %vm1832_vm2 = vcmp.ge.s32.totalorder %v302_v32, 1 }
 0x178   : > { %vm1842_vm3 = vcmp.le.s32.totalorder %v302_v32, 16  ;;  %v2332_v9 = vrot.slane %v1826_v50, %v4361_v13  ;;  %v1681_v24 = vcombine.high %v4763_v40, %v4763_v40 }
 0x179   : > { %v2293_v5 = vcombine.low %v1801_v36, %v1809_v48  ;;  %v1817_v10 = vcombine.high %v1809_v48, %v1809_v48  ;;  %vm5052_vm7 = vmand %vm1832_vm2, %vm1842_vm3  ;;  %vm2926_vm2 = vcmask 130048   ;;  %vm2943_vm3 = vcmask 195584  }
 0x17a   : > { %2821 = vrot.lane.b32.xlu1 %v2440_v53, %s5738_s21  ;;  %vm1875_vm11 = vmand %vm5052_vm7, %vm1857_vm4  ;;  %v2392_v11 = vsel %vm1922_vm8, %v2332_v9, 0.0  ;;  %v5090_v29 = vsel %vm5052_vm7, %v4786_v16, 0.0  ;;  %vm2993_vm8 = vcmask 392192  }
 0x17b   : > { %2775 = vrot.lane.b32.xlu0 %v4964_v7, %s5736_s22  ;;  %v2309_v30 = vcombine.low %v1817_v10, %v1816_v2  ;;  %v2307_v57 = vrot.slane %v2293_v5, %v4361_v13  ;;  %v5080_v18 = vsel %vm1875_vm11, %v4784_v15, 0.0  ;;  %v2518_v12 = vrot.slane %v2392_v11, 1  ;;  %vm1910_vm12 = vmand %vm5052_vm7, %vm1892_vm6 }
 0x17c   : > { %v2523_v44 = vrot.slane %v2392_v11, 2  ;;  %v2443_v40 = vrot.slane %v5080_v18, 1  ;;  %v2484_v38 = vrot.slane %v5080_v18, 2  ;;  %vm2976_vm7 = vcmask 326656  }
 0x17d   : > { %v2317_v26 = vrot.slane %v2309_v30, %v4361_v13  ;;  %v2308_v37 = vcombine.low %v2300_v22, %v2307_v57  ;;  %v2444_v57 = vrot.slane %v5090_v29, 1  ;;  %vm3010_vm11 = vcmask 457728  }
 0x17e   : > { %2681 = vrot.lane.b32.xlu1 %v2440_v53, %s5739_s17 }
 0x17f   : > { %2635 = vrot.lane.b32.xlu0 %v4964_v7, %s5737_s16  ;;  %v2325_v36 = vcombine.low %v2317_v26, %v2324_v34  ;;  %v5040_v42 = vsel %vm1887_vm5, %v2308_v37, 0.0  ;;  %v2168_v34 = vrot.slane %v1681_v24, %v4361_v13  ;;  %v2445_v35 = vsel %vm2417_vm10, %v2443_v40, %v2444_v57 }
 0x180   : > { %v2515_v52 = vrot.slane %v5040_v42, 1  ;;  %v2485_v37 = vrot.slane %v5090_v29, 2 }
 0x181   : > { %v5044_v51 = vsel %vm5031_vm0, %v2325_v36, 0.0  ;;  %v2380_v14 = vsel %vm1910_vm12, %v2168_v34, 0.0  ;;  %vm5141_vm0 = vmand %vm1833_vm13, %vm1843_vm14  ;;  %vm3027_vm12 = vcmask 523264   ;;  %vm3060_vm13 = vcmask 588800  }
 0x182   : > { %2869 = vrot.lane.b32.xlu1 %v2481_v33, %s4227_s13  ;;  %v2516_v55 = vrot.slane %v5044_v51, 1  ;;  %v2521_v48 = vrot.slane %v5044_v51, 2  ;;  %v2446_v36 = vrot.slane %v2380_v14, 1  ;;  %v2487_v9 = vrot.slane %v2380_v14, 2  ;;  %vm1878_vm5 = vmand %vm5141_vm0, %vm1857_vm4 }
 0x183   : > { %2823 = vrot.lane.b32.xlu0 %v2442_v17, %s5738_s21  ;;  %vm1913_vm14 = vmand %vm5141_vm0, %vm1892_vm6 }
 0x184   : > { %v5057_v28 = vsel %vm2417_vm10, %v2515_v52, %v2516_v55  ;;  %v5093_v30 = vsel %vm2417_vm10, %v2516_v55, %v2518_v12  ;;  %v5096_v15 = vsel %vm5714_vm9, %v2521_v48, %v2523_v44  ;;  %v2486_v52 = vsel %vm5714_vm9, %v2484_v38, %v2485_v37 }
 0x185   : > { %v2488_v44 = vsel %vm5714_vm9, %v2485_v37, %v2487_v9  ;;  %v5162_v37 = vsel %vm1878_vm5, %v4843_v58, 0.0 }
 0x186   : > { %2683 = vrot.lane.b32.xlu1 %v2442_v17, %s5739_s17 }
 0x187   : > { %2541 = vrot.lane.b32.xlu0 %v2440_v53, %s5735_s10  ;;  %v2520_v53 = vrot.slane %v5040_v42, 2 }
 0x189   : > { %v5060_v2 = vsel %vm5714_vm9, %v2520_v53, %v2521_v48  ;;  %v2447_v53 = vsel %vm2417_vm10, %v2444_v57, %v2446_v36 }
 0x18a   : > { %2871 = vrot.lane.b32.xlu1 %v2483_v47, %s4227_s13 }
 0x18b   : > { %2729 = vrot.lane.b32.xlu0 %v2481_v33, %s5729_s20 }
 0x18c   : > { %v5062_v5 = vpop.permute.xlu1 %2573 }
 0x18d   : > { %v2526_v6 = vpop.permute.xlu0 %2525 }
 0x18e   : > { %2589 = vrot.lane.b32.xlu1 %v2481_v33, %s5734_s23  ;;  %v2910_v40 = vsel %vm2909_vm15, %v4606_v0, %v2526_v6 }
 0x18f   : > { %2543 = vrot.lane.b32.xlu0 %v2442_v17, %s5735_s10 }
 0x190   : > { %v5075_v63 = vpop.permute.xlu1 %2575 }
 0x191   : > { %v5077_v10 = vpop.permute.xlu0 %2527 }
 0x192   : > { %2777 = vrot.lane.b32.xlu1 %v5080_v18, %s5736_s22  ;;  %v2911_v58 = vsel %vm2909_vm15, %v4617_v20, %v5077_v10 }
 0x193   : > { %2731 = vrot.lane.b32.xlu0 %v2483_v47, %s5729_s20  ;;  %v2928_v20 = vsel %vm2926_vm2, %v2911_v58, %v5075_v63 }
 0x194   : > { %v5098_v17 = vpop.permute.xlu1 %2623 }
 0x195   : > { %v2622_v33 = vpop.permute.xlu0 %2621  ;;  %v2945_v27 = vsel %vm2943_vm3, %v2928_v20, %v5098_v17 }
 0x196   : > { %2637 = vrot.lane.b32.xlu1 %v5080_v18, %s5737_s16 }
 0x197   : > { %2591 = vrot.lane.b32.xlu0 %v2483_v47, %s5734_s23 }
 0x198   : > { %v5110_v16 = vpop.permute.xlu1 %2529 }
 0x199   : > { %v2670_v32 = vpop.permute.xlu0 %2669 }
 0x19a   : > { %2825 = vrot.lane.b32.xlu1 %v2445_v35, %s5738_s21 }
 0x19b   : > { %2779 = vrot.lane.b32.xlu0 %v5090_v29, %s5736_s22 }
 0x19c   : > { %v2718_v22 = vpop.permute.xlu1 %2717 }
 0x19d   : > { %v5116_v26 = vpop.permute.xlu0 %2671 }
 0x19e   : > { %2685 = vrot.lane.b32.xlu1 %v2445_v35, %s5739_s17 }
 0x19f   : > { %2639 = vrot.lane.b32.xlu0 %v5090_v29, %s5737_s16 }
 0x1a0   : > { %v5123_v47 = vpop.permute.xlu1 %2577 }
 0x1a1   : > { %v5125_v50 = vpop.permute.xlu0 %2531 }
 0x1a2   : > { %2873 = vrot.lane.b32.xlu1 %v2486_v52, %s4227_s13 }
 0x1a3   : > { %2827 = vrot.lane.b32.xlu0 %v2447_v53, %s5738_s21 }
 0x1a4   : > { %v2766_v48 = vpop.permute.xlu1 %2765 }
 0x1a5   : > { %v2720_v55 = vpop.permute.xlu0 %2719 }
 0x1a6   : > { %2687 = vrot.lane.b32.xlu1 %v2447_v53, %s5739_s17 }
 0x1a7   : > { %2545 = vrot.lane.b32.xlu0 %v2445_v35, %s5735_s10  ;;  %v2927_v35 = vsel %vm2926_vm2, %v2910_v40, %v5062_v5 }
 0x1a8   : > { %v5136_v12 = vpop.permute.xlu1 %2625  ;;  %v2944_v14 = vsel %vm2943_vm3, %v2927_v35, %v2622_v33  ;;  %v5172_v33 = vsel %vm5141_vm0, %v4875_v62, 0.0  ;;  %v2448_v62 = vrot.slane %v5162_v37, 1 }
 0x1a9   : > { %v5134_v11 = vpop.permute.xlu0 %2579  ;;  %v2960_v38 = vsel %vm1172_vm1, %v2944_v14, %v2670_v32 }
 0x1aa   : > { %2875 = vrot.lane.b32.xlu1 %v2488_v44, %s4227_s13  ;;  %v2977_v36 = vsel %vm2976_vm7, %v2960_v38, %v2718_v22 }
 0x1ab   : > { %2733 = vrot.lane.b32.xlu0 %v2486_v52, %s5729_s20  ;;  %v2994_v5 = vsel %vm2993_vm8, %v2977_v36, %v2766_v48  ;;  %v2449_v48 = vrot.slane %v5172_v33, 1 }
 0x1ac   : > { %v2814_v34 = vpop.permute.xlu1 %2813 }
 0x1ad   : > { %v2768_v57 = vpop.permute.xlu0 %2767  ;;  %v3011_v32 = vsel %vm3010_vm11, %v2994_v5, %v2814_v34  ;;  %v2450_v40 = vsel %vm2417_vm10, %v2448_v62, %v2449_v48  ;;  %v2383_v34 = vsel %vm1913_vm14, %v2209_v56, 0.0 }
 0x1ae   : > { %2593 = vrot.lane.b32.xlu1 %v2486_v52, %s5734_s23  ;;  %v2451_v36 = vrot.slane %v2383_v34, 1  ;;  %v2492_v56 = vrot.slane %v2383_v34, 2 }
 0x1af   : > { %2547 = vrot.lane.b32.xlu0 %v2447_v53, %s5735_s10 }
 0x1b0   : > { %v5158_v6 = vpop.permute.xlu1 %2673  ;;  %v2452_v58 = vsel %vm2417_vm10, %v2449_v48, %v2451_v36 }
 0x1b1   : > { %v5156_v0 = vpop.permute.xlu0 %2627 }
 0x1b2   : > { %2781 = vrot.lane.b32.xlu1 %v5162_v37, %s5736_s22 }
 0x1b3   : > { %2735 = vrot.lane.b32.xlu0 %v2488_v44, %s5729_s20 }
 0x1b4   : > { %v2862_v22 = vpop.permute.xlu1 %2861 }
 0x1b5   : > { %v2816_v52 = vpop.permute.xlu0 %2815  ;;  %v3028_v53 = vsel %vm3027_vm12, %v3011_v32, %v2862_v22 }
 0x1b6   : > { %3911 = vmatprep.mubr.msk.f32.mxu1 %vm3060_vm13, %v3028_v53  ;;  %2641 = vrot.lane.b32.xlu1 %v5162_v37, %s5737_s16  ;;  %v304_v53 = vadd.s32 7, %v4559_v21 }
 0x1b7   : > { %2595 = vrot.lane.b32.xlu0 %v2488_v44, %s5734_s23  ;;  %v2961_v44 = vsel %vm1172_vm1, %v2945_v27, %v5116_v26  ;;  %v2489_v26 = vrot.slane %v5162_v37, 2 }
 0x1b8   : > { %v5195_v10 = vpop.permute.xlu1 %2675  ;;  %v2978_v63 = vsel %vm2976_vm7, %v2961_v44, %v2720_v55  ;;  %v2490_v55 = vrot.slane %v5172_v33, 2  ;;  %vm1834_vm0 = vcmp.ge.s32.totalorder %v304_v53, 1  ;;  %vm1844_vm5 = vcmp.le.s32.totalorder %v304_v53, 16 }
 0x1b9   : > { %v5197_v9 = vpop.permute.xlu0 %2533  ;;  %v2995_v24 = vsel %vm2993_vm8, %v2978_v63, %v2768_v57  ;;  %vm5233_vm14 = vmand %vm1834_vm0, %vm1844_vm5  ;;  %v2912_v63 = vsel %vm2909_vm15, %v4667_v1, %v5110_v16  ;;  %v1750_v16 = vcombine.high %v4857_v19, %v4857_v19 }
 0x1ba   : > { %2829 = vrot.lane.b32.xlu1 %v2450_v40, %s5738_s21  ;;  %v3012_v17 = vsel %vm3010_vm11, %v2995_v24, %v2816_v52  ;;  %v2491_v32 = vsel %vm5714_vm9, %v2489_v26, %v2490_v55  ;;  %v2493_v48 = vsel %vm5714_vm9, %v2490_v55, %v2492_v56  ;;  %vm1881_vm9 = vmand %vm5233_vm14, %vm1857_vm4 }
 0x1bb   : > { %2783 = vrot.lane.b32.xlu0 %v5172_v33, %s5736_s22  ;;  %v5261_v8 = vsel %vm1881_vm9, %v4888_v39, 0.0  ;;  %v2913_v39 = vsel %vm2909_vm15, %v4657_v60, %v5125_v50  ;;  %v2250_v36 = vrot.slane %v1750_v16, %v4361_v13  ;;  %vm1916_vm4 = vmand %vm5233_vm14, %vm1892_vm6  ;;  %vm5752_vm6 = vcmask 1045504  }
 0x1bc   : > { %v2864_v35 = vpop.permute.xlu1 %2863  ;;  %v2453_v26 = vrot.slane %v5261_v8, 1  ;;  %v2930_v55 = vsel %vm2926_vm2, %v2913_v39, %v5134_v11  ;;  %vm5753_vm9 = vmmov %vm5752_vm6 }
 0x1bd   : > { %v2722_v14 = vpop.permute.xlu0 %2721  ;;  %v3029_v38 = vsel %vm3027_vm12, %v3012_v17, %v2864_v35  ;;  %v2947_v13 = vsel %vm2943_vm3, %v2930_v55, %v5156_v0  ;;  %v2386_v25 = vsel %vm1916_vm4, %v2250_v36, 0.0 }
 0x1be   : > { %3912 = vmatmul.mubr.msk.f32.vlgmr.msra.gmra.mrb[0].mxu1 %vm3060_vm13, %v3029_v38  ;;  %2689 = vrot.lane.b32.xlu1 %v2450_v40, %s5739_s17  ;;  %v2497_v16 = vrot.slane %v2386_v25, 2 }
 0x1bf   : > { %2643 = vrot.lane.b32.xlu0 %v5172_v33, %s5737_s16 }
 0x1c0   : > { %v5215_v57 = vpop.permute.xlu1 %2581 }
 0x1c1   : > { %v5217_v5 = vpop.permute.xlu0 %2535 }
 0x1c2   : > { %2877 = vrot.lane.b32.xlu1 %v2491_v32, %s4227_s13 }
 0x1c3   : > { %2831 = vrot.lane.b32.xlu0 %v2452_v58, %s5738_s21 }
 0x1c4   : > { %v2770_v52 = vpop.permute.xlu1 %2769 }
 0x1c5   : > { %v2724_v22 = vpop.permute.xlu0 %2723 }
 0x1c6   : > { %2691 = vrot.lane.b32.xlu1 %v2452_v58, %s5739_s17 }
 0x1c7   : > { %2549 = vrot.lane.b32.xlu0 %v2450_v40, %s5735_s10  ;;  %v2929_v40 = vsel %vm2926_vm2, %v2912_v63, %v5123_v47 }
 0x1c8   : > { %v5228_v20 = vpop.permute.xlu1 %2629  ;;  %v2946_v34 = vsel %vm2943_vm3, %v2929_v40, %v5136_v12  ;;  %v5269_v12 = vsel %vm5233_vm14, %v4894_v41, 0.0 }
 0x1c9   : > { %v5226_v62 = vpop.permute.xlu0 %2583  ;;  %v2962_v1 = vsel %vm1172_vm1, %v2946_v34, %v5158_v6  ;;  %v2454_v41 = vrot.slane %v5269_v12, 1 }
 0x1ca   : > { %2879 = vrot.lane.b32.xlu1 %v2493_v48, %s4227_s13  ;;  %v2979_v47 = vsel %vm2976_vm7, %v2962_v1, %v2722_v14 }
 0x1cb   : > { %2737 = vrot.lane.b32.xlu0 %v2491_v32, %s5729_s20  ;;  %v2996_v35 = vsel %vm2993_vm8, %v2979_v47, %v2770_v52  ;;  %v2455_v11 = vsel %vm2417_vm10, %v2453_v26, %v2454_v41 }
 0x1cc   : > { %v2818_v44 = vpop.permute.xlu1 %2817 }
 0x1cd   : > { %v2772_v27 = vpop.permute.xlu0 %2771  ;;  %v3013_v6 = vsel %vm3010_vm11, %v2996_v35, %v2818_v44  ;;  %v2456_v44 = vrot.slane %v2386_v25, 1 }
 0x1ce   : > { %2597 = vrot.lane.b32.xlu1 %v2491_v32, %s5734_s23 }
 0x1cf   : > { %2551 = vrot.lane.b32.xlu0 %v2452_v58, %s5735_s10  ;;  %v2963_v58 = vsel %vm1172_vm1, %v2947_v13, %v5195_v10  ;;  %v2494_v10 = vrot.slane %v5261_v8, 2  ;;  %v2457_v63 = vsel %vm2417_vm10, %v2454_v41, %v2456_v44 }
 0x1d0   : > { %v5252_v17 = vpop.permute.xlu1 %2677  ;;  %v2980_v32 = vsel %vm2976_vm7, %v2963_v58, %v2724_v22  ;;  %v2495_v22 = vrot.slane %v5269_v12, 2 }
 0x1d1   : > { %v5250_v24 = vpop.permute.xlu0 %2631  ;;  %v2997_v52 = vsel %vm2993_vm8, %v2980_v32, %v2772_v27  ;;  %v2915_v32 = vsel %vm2909_vm15, %v4734_v4, %v5217_v5 }
 0x1d2   : > { %2785 = vrot.lane.b32.xlu1 %v5261_v8, %s5736_s22  ;;  %v2496_v40 = vsel %vm5752_vm6, %v2494_v10, %v2495_v22 }
 0x1d3   : > { %2739 = vrot.lane.b32.xlu0 %v2493_v48, %s5729_s20 }
 0x1d4   : > { %v2866_v19 = vpop.permute.xlu1 %2865 }
 0x1d5   : > { %v2820_v38 = vpop.permute.xlu0 %2819  ;;  %v3030_v14 = vsel %vm3027_vm12, %v3013_v6, %v2866_v19  ;;  %v2498_v6 = vsel %vm5753_vm9, %v2495_v22, %v2497_v16  ;;  %v3270_v16 = vld [vmem:[%s5697_s5] sm:$0xff] }
 0x1d6   : > { %3914 = vmatprep.mubr.msk.f32.mxu1 %vm3060_vm13, %v3030_v14  ;;  %2645 = vrot.lane.b32.xlu1 %v5261_v8, %s5737_s16  ;;  %v3014_v0 = vsel %vm3010_vm11, %v2997_v52, %v2820_v38  ;;  %v2914_v14 = vsel %vm2909_vm15, %v4727_v3, %v5197_v9 }
 0x1d7   : > { %2599 = vrot.lane.b32.xlu0 %v2493_v48, %s5734_s23  ;;  %v2931_v39 = vsel %vm2926_vm2, %v2914_v14, %v5215_v57  ;;  %3935 = vmatprep.subr.mxu1 %v3270_v16 }
 0x1d8   : > { %v2680_v60 = vpop.permute.xlu1 %2679  ;;  %v2948_v36 = vsel %vm2943_vm3, %v2931_v39, %v5228_v20  ;;  %3936 = vmatpush3.msra.mxu1 %v3270_v16 }
 0x1d9   : > { %v5291_v50 = vpop.permute.xlu0 %2537  ;;  %v2964_v55 = vsel %vm1172_vm1, %v2948_v36, %v5252_v17  ;;  %v2932_v17 = vsel %vm2926_vm2, %v2915_v32, %v5226_v62 }
 0x1da   : > { %2833 = vrot.lane.b32.xlu1 %v2455_v11, %s5738_s21 }
 0x1db   : > { %2787 = vrot.lane.b32.xlu0 %v5269_v12, %s5736_s22 }
 0x1dc   : > { %v2868_v53 = vpop.permute.xlu1 %2867 }
 0x1dd   : > { %v2726_v56 = vpop.permute.xlu0 %2725  ;;  %v3031_v48 = vsel %vm3027_vm12, %v3014_v0, %v2868_v53 }
 0x1de   : > { %3915 = vmatmul.mubr.msk.f32.gmra.mrb[2].mxu1 %vm3060_vm13, %v3031_v48  ;;  %2693 = vrot.lane.b32.xlu1 %v2455_v11, %s5739_s17  ;;  %v2981_v13 = vsel %vm2976_vm7, %v2964_v55, %v2726_v56 }
 0x1df   : > { %2647 = vrot.lane.b32.xlu0 %v5269_v12, %s5737_s16 }
 0x1e0   : > { %v5309_v27 = vpop.permute.xlu1 %2585 }
 0x1e1   : > { %v5311_v21 = vpop.permute.xlu0 %2539 }
 0x1e2   : > { %2881 = vrot.lane.b32.xlu1 %v2496_v40, %s4227_s13 }
 0x1e3   : > { %2835 = vrot.lane.b32.xlu0 %v2457_v63, %s5738_s21 }
 0x1e4   : > { %v2774_v1 = vpop.permute.xlu1 %2773 }
 0x1e5   : > { %v2728_v34 = vpop.permute.xlu0 %2727  ;;  %v2998_v3 = vsel %vm2993_vm8, %v2981_v13, %v2774_v1 }
 0x1e6   : > { %2695 = vrot.lane.b32.xlu1 %v2457_v63, %s5739_s17 }
 0x1e7   : > { %2553 = vrot.lane.b32.xlu0 %v2455_v11, %s5735_s10  ;;  %v2949_v11 = vsel %vm2943_vm3, %v2932_v17, %v5250_v24 }
 0x1e8   : > { %v2634_v35 = vpop.permute.xlu1 %2633  ;;  %v2965_v0 = vsel %vm1172_vm1, %v2949_v11, %v2680_v60 }
 0x1e9   : > { %v5319_v47 = vpop.permute.xlu0 %2587  ;;  %v2982_v4 = vsel %vm2976_vm7, %v2965_v0, %v2728_v34 }
 0x1ea   : > { %2883 = vrot.lane.b32.xlu1 %v2498_v6, %s4227_s13 }
 0x1eb   : > { %2741 = vrot.lane.b32.xlu0 %v2496_v40, %s5729_s20 }
 0x1ec   : > { %v2822_v38 = vpop.permute.xlu1 %2821 }
 0x1ed   : > { %v2776_v19 = vpop.permute.xlu0 %2775  ;;  %v3015_v9 = vsel %vm3010_vm11, %v2998_v3, %v2822_v38 }
 0x1ee   : > { %2601 = vrot.lane.b32.xlu1 %v2496_v40, %s5734_s23  ;;  %v2999_v5 = vsel %vm2993_vm8, %v2982_v4, %v2776_v19 }
 0x1ef   : > { %2555 = vrot.lane.b32.xlu0 %v2457_v63, %s5735_s10  ;;  %v2916_v63 = vsel %vm2909_vm15, %v4851_v61, %v5291_v50 }
 0x1f0   : > { %v2682_v41 = vpop.permute.xlu1 %2681 }
 0x1f1   : > { %v5333_v26 = vpop.permute.xlu0 %2635 }
 0x1f2   : > { %2789 = vrot.lane.b32.xlu1 %v4967_v23, %s5736_s22 }
 0x1f3   : > { %2743 = vrot.lane.b32.xlu0 %v2498_v6, %s5729_s20 }
 0x1f4   : > { %v2870_v57 = vpop.permute.xlu1 %2869 }
 0x1f5   : > { %v2824_v58 = vpop.permute.xlu0 %2823  ;;  %v3032_v20 = vsel %vm3027_vm12, %v3015_v9, %v2870_v57 }
 0x1f6   : > { %3917 = vmatprep.mubr.msk.f32.mxu1 %vm3060_vm13, %v3032_v20  ;;  %2649 = vrot.lane.b32.xlu1 %v4967_v23, %s5737_s16  ;;  %v3016_v23 = vsel %vm3010_vm11, %v2999_v5, %v2824_v58 }
 0x1f7   : > { %2603 = vrot.lane.b32.xlu0 %v2498_v6, %s5734_s23  ;;  %s3746_s23 = sshll.u32 %s4198_s27, 4 }
 0x1f8   : > { %v2684_v25 = vpop.permute.xlu1 %2683 }
 0x1f9   : > { %v5355_v52 = vpop.permute.xlu0 %2541 }
 0x1fa   : > { %2837 = vrot.lane.b32.xlu1 %v4995_v45, %s5738_s21  ;;  %v2918_v57 = vsel %vm2909_vm15, %v4953_v49, %v5355_v52 }
 0x1fb   : > { %2791 = vrot.lane.b32.xlu0 %v4974_v31, %s5736_s22 }
 0x1fc   : > { %v2872_v62 = vpop.permute.xlu1 %2871 }
 0x1fd   : > { %v2730_v53 = vpop.permute.xlu0 %2729  ;;  %v3033_v24 = vsel %vm3027_vm12, %v3016_v23, %v2872_v62 }
 0x1fe   : > { %3918 = vmatmul.mubr.msk.f32.gmra.mrb[4].mxu1 %vm3060_vm13, %v3033_v24  ;;  %2697 = vrot.lane.b32.xlu1 %v4995_v45, %s5739_s17 }
 0x1ff   : > { %2651 = vrot.lane.b32.xlu0 %v4974_v31, %s5737_s16  ;;  %s283_s16 = sand.u32 1, %s4190_s25  }
 0x200   : > { %v2590_v60 = vpop.permute.xlu1 %2589 }
 0x201   : > { %v5371_v56 = vpop.permute.xlu0 %2543  ;;  %v2935_v58 = vsel %vm2926_vm2, %v2918_v57, %v2590_v60 }
 0x202   : > { %2885 = vrot.lane.b32.xlu1 %v4998_v46, %s4227_s13  ;;  %v2919_v49 = vsel %vm2909_vm15, %v4964_v7, %v5371_v56 }
 0x203   : > { %2839 = vrot.lane.b32.xlu0 %v5007_v54, %s5738_s21 }
 0x204   : > { %v2778_v44 = vpop.permute.xlu1 %2777 }
 0x205   : > { %v2732_v48 = vpop.permute.xlu0 %2731 }
 0x206   : > { %2745 = vrot.lane.b32.xlu1 %v4998_v46, %s5729_s20  ;;  %v2933_v46 = vsel %vm2926_vm2, %v2916_v63, %v5309_v27 }
 0x207   : > { %2699 = vrot.lane.b32.xlu0 %v5007_v54, %s5739_s17  ;;  %v2950_v54 = vsel %vm2943_vm3, %v2933_v46, %v2634_v35  ;;  %v2917_v35 = vsel %vm2909_vm15, %v4872_v43, %v5311_v21  ;;  %s3675_s17 = sshll.u32 %s283_s16, 7 }
 0x208   : > { %v2638_v45 = vpop.permute.xlu1 %2637 }
 0x209   : > { %v5381_v31 = vpop.permute.xlu0 %2591  ;;  %v2952_v32 = vsel %vm2943_vm3, %v2935_v58, %v2638_v45 }
 0x20a   : > { %2747 = vrot.lane.b32.xlu1 %v5010_v59, %s5729_s20  ;;  %v2936_v52 = vsel %vm2926_vm2, %v2919_v49, %v5381_v31  ;;  %s5544_s20 = scalar_lea.vmem [#allocation2], %s3675_s17  ;;  %s5639_s17 = scalar_lea.sflag [#allocation3], %s283_s16 }
 0x20b   : > { %2887 = vrot.lane.b32.xlu0 %v5010_v59, %s4227_s13  ;;  %v2966_v59 = vsel %vm1172_vm1, %v2950_v54, %v2682_v41  ;;  %s3592_s18 = sshll.u32 %s5544_s20, 4  ;;  %s5626_s18 = int_to_ptr.vmem [resolvable:$true] %s3592_s18 }
 0x20c   : > { %v2826_v22 = vpop.permute.xlu1 %2825  ;;  %v2983_v1 = vsel %vm2976_vm7, %v2966_v59, %v2730_v53 }
 0x20d   : > { %v2780_v10 = vpop.permute.xlu0 %2779  ;;  %v3000_v61 = vsel %vm2993_vm8, %v2983_v1, %v2778_v44 }
 0x20e   : > { %2795 = vrot.lane.b32.xlu1 %v5044_v51, %s5736_s22 }
 0x20f   : > { %2793 = vrot.lane.b32.xlu0 %v5040_v42, %s5736_s22  ;;  %v3017_v42 = vsel %vm3010_vm11, %v3000_v61, %v2826_v22 }
 0x210   : > { %v2686_v34 = vpop.permute.xlu1 %2685 }
 0x211   : > { %v2640_v40 = vpop.permute.xlu0 %2639  ;;  %v2968_v11 = vsel %vm1172_vm1, %v2952_v32, %v2686_v34 }
 0x212   : > { %2843 = vrot.lane.b32.xlu1 %v5093_v30, %s5738_s21  ;;  %v2953_v24 = vsel %vm2943_vm3, %v2936_v52, %v2640_v40 }
 0x213   : > { %2841 = vrot.lane.b32.xlu0 %v5057_v28, %s5738_s21  ;;  %v2934_v28 = vsel %vm2926_vm2, %v2917_v35, %v5319_v47 }
 0x214   : > { %v2874_v50 = vpop.permute.xlu1 %2873  ;;  %v2951_v30 = vsel %vm2943_vm3, %v2934_v28, %v5333_v26 }
 0x215   : > { %v2828_v51 = vpop.permute.xlu0 %2827  ;;  %v3034_v27 = vsel %vm3027_vm12, %v3017_v42, %v2874_v50  ;;  %v2967_v43 = vsel %vm1172_vm1, %v2951_v30, %v2684_v25 }
 0x216   : > { %3920 = vmatprep.mubr.msk.f32.mxu1 %vm3060_vm13, %v3034_v27  ;;  %2891 = vrot.lane.b32.xlu1 %v5096_v15, %s4227_s13  ;;  %v2984_v21 = vsel %vm2976_vm7, %v2967_v43, %v2732_v48 }
 0x217   : > { %2889 = vrot.lane.b32.xlu0 %v5060_v2, %s4227_s13  ;;  %v3001_v38 = vsel %vm2993_vm8, %v2984_v21, %v2780_v10  ;;  %s3742_s13 = sshll.u32 %s4202_s28, 5 }
 0x218   : > { %v2688_v6 = vpop.permute.xlu1 %2687  ;;  %v3018_v2 = vsel %vm3010_vm11, %v3001_v38, %v2828_v51  ;;  %s3589_s22 = sadd.s32 %s3746_s23, %s3742_s13  ;;  %s4120_s23 = scalar_lea.vmem %s5626_s18, 2048 }
 0x219   : > { %v2546_v19 = vpop.permute.xlu0 %2545  ;;  %v2969_v48 = vsel %vm1172_vm1, %v2953_v24, %v2688_v6  ;;  %p4121_p13 = scmp.ne.s32.totalorder %s5626_s18, %s4120_s23  ;;  %s4228_s13 = smov [#allocation2]  }
 0x21a   : > { %v2920_v61 = vsel %vm2909_vm15, %v5080_v18, %v2546_v19 }
 0x21b   : > { %p4122_p0 = pnand %p4121_p13, %p4321_p3 }
 0x21c   : > { %v2876_v14 = vpop.permute.xlu1 %2875 }
 0x21d   : > { %v2734_v47 = vpop.permute.xlu0 %2733  ;;  %v3035_v39 = vsel %vm3027_vm12, %v3018_v2, %v2876_v14  ;;  %p4123_p1 = pneg %p4122_p0 }
 0x21e   : > { %3921 = vmatmul.mubr.msk.f32.gmra.mrb[6].mxu1 %vm3060_vm13, %v3035_v39  ;;  %v2985_v25 = vsel %vm2976_vm7, %v2968_v11, %v2734_v47 }
 0x220   : > { %v2594_v15 = vpop.permute.xlu1 %2593 }
 0x221   : > { %v2548_v36 = vpop.permute.xlu0 %2547  ;;  %v2937_v42 = vsel %vm2926_vm2, %v2920_v61, %v2594_v15 }
 0x222   : > { %v2921_v18 = vsel %vm2909_vm15, %v5090_v29, %v2548_v36 }
 0x224   : > { %v2782_v41 = vpop.permute.xlu1 %2781 }
 0x225   : > { %v2736_v26 = vpop.permute.xlu0 %2735  ;;  %v3002_v0 = vsel %vm2993_vm8, %v2985_v25, %v2782_v41 }
 0x226   : > { %v2986_v44 = vsel %vm2976_vm7, %v2969_v48, %v2736_v26 }
 0x228   : > { %v2642_v13 = vpop.permute.xlu1 %2641 }
 0x229   : > { %v2596_v55 = vpop.permute.xlu0 %2595  ;;  %v2954_v51 = vsel %vm2943_vm3, %v2937_v42, %v2642_v13 }
 0x22a   : > { %v2938_v19 = vsel %vm2926_vm2, %v2921_v18, %v2596_v55 }
 0x22c   : > { %v2830_v9 = vpop.permute.xlu1 %2829 }
 0x22d   : > { %v2784_v3 = vpop.permute.xlu0 %2783  ;;  %v3019_v5 = vsel %vm3010_vm11, %v3002_v0, %v2830_v9 }
 0x22e   : > { %v3003_v45 = vsel %vm2993_vm8, %v2986_v44, %v2784_v3 }
 0x230   : > { %v2690_v17 = vpop.permute.xlu1 %2689 }
 0x231   : > { %v2644_v20 = vpop.permute.xlu0 %2643  ;;  %v2970_v16 = vsel %vm1172_vm1, %v2954_v51, %v2690_v17 }
 0x232   : > { %v2955_v2 = vsel %vm2943_vm3, %v2938_v19, %v2644_v20 }
 0x234   : > { %v2878_v23 = vpop.permute.xlu1 %2877 }
 0x235   : > { %v2832_v4 = vpop.permute.xlu0 %2831  ;;  %v3036_v62 = vsel %vm3027_vm12, %v3019_v5, %v2878_v23 }
 0x236   : > { %3923 = vmatprep.mubr.msk.f32.mxu1 %vm3060_vm13, %v3036_v62  ;;  %v3020_v22 = vsel %vm3010_vm11, %v3003_v45, %v2832_v4 }
 0x238   : > { %v2692_v60 = vpop.permute.xlu1 %2691 }
 0x239   : > { %v2550_v53 = vpop.permute.xlu0 %2549  ;;  %v2971_v47 = vsel %vm1172_vm1, %v2955_v2, %v2692_v60 }
 0x23a   : > { %v2922_v17 = vsel %vm2909_vm15, %v5162_v37, %v2550_v53 }
 0x23c   : > { %v2880_v63 = vpop.permute.xlu1 %2879 }
 0x23d   : > { %v2738_v10 = vpop.permute.xlu0 %2737  ;;  %v3037_v7 = vsel %vm3027_vm12, %v3020_v22, %v2880_v63 }
 0x23e   : > { %3924 = vmatmul.mubr.msk.f32.gmra.mrb[8].mxu1 %vm3060_vm13, %v3037_v7  ;;  %v2987_v35 = vsel %vm2976_vm7, %v2970_v16, %v2738_v10 }
 0x240   : > { %v2598_v31 = vpop.permute.xlu1 %2597 }
 0x241   : > { %v2552_v56 = vpop.permute.xlu0 %2551  ;;  %v2939_v11 = vsel %vm2926_vm2, %v2922_v17, %v2598_v31 }
 0x242   : > { %v2923_v60 = vsel %vm2909_vm15, %v5172_v33, %v2552_v56 }
 0x244   : > { %v2786_v54 = vpop.permute.xlu1 %2785 }
 0x245   : > { %v2740_v46 = vpop.permute.xlu0 %2739  ;;  %v3004_v28 = vsel %vm2993_vm8, %v2987_v35, %v2786_v54 }
 0x246   : > { %v2988_v39 = vsel %vm2976_vm7, %v2971_v47, %v2740_v46 }
 0x248   : > { %v2646_v34 = vpop.permute.xlu1 %2645 }
 0x249   : > { %v2600_v40 = vpop.permute.xlu0 %2599  ;;  %v2956_v0 = vsel %vm2943_vm3, %v2939_v11, %v2646_v34 }
 0x24a   : > { %v2940_v53 = vsel %vm2926_vm2, %v2923_v60, %v2600_v40 }
 0x24c   : > { %v2834_v1 = vpop.permute.xlu1 %2833 }
 0x24d   : > { %v2788_v59 = vpop.permute.xlu0 %2787  ;;  %v3021_v6 = vsel %vm3010_vm11, %v3004_v28, %v2834_v1 }
 0x24e   : > { %v3005_v15 = vsel %vm2993_vm8, %v2988_v39, %v2788_v59 }
 0x250   : > { %v2694_v27 = vpop.permute.xlu1 %2693 }
 0x251   : > { %v2648_v50 = vpop.permute.xlu0 %2647  ;;  %v2972_v5 = vsel %vm1172_vm1, %v2956_v0, %v2694_v27 }
 0x252   : > { %v2957_v48 = vsel %vm2943_vm3, %v2940_v53, %v2648_v50 }
 0x254   : > { %v2882_v43 = vpop.permute.xlu1 %2881 }
 0x255   : > { %v2836_v30 = vpop.permute.xlu0 %2835  ;;  %v3038_v21 = vsel %vm3027_vm12, %v3021_v6, %v2882_v43 }
 0x256   : > { %3926 = vmatprep.mubr.msk.f32.mxu1 %vm3060_vm13, %v3038_v21  ;;  %v3022_v41 = vsel %vm3010_vm11, %v3005_v15, %v2836_v30 }
 0x258   : > { %v2696_v14 = vpop.permute.xlu1 %2695 }
 0x259   : > { %v2554_v38 = vpop.permute.xlu0 %2553  ;;  %v2973_v45 = vsel %vm1172_vm1, %v2957_v48, %v2696_v14 }
 0x25a   : > { %v2924_v40 = vsel %vm2909_vm15, %v5261_v8, %v2554_v38  ;;  %v3705_v38 = vld [vmem:[%s5696_s4] ss:$0 sm:$0xff] }
 0x25c   : > { %v2884_v13 = vpop.permute.xlu1 %2883 }
 0x25d   : > { %v2742_v26 = vpop.permute.xlu0 %2741  ;;  %v3039_v29 = vsel %vm3027_vm12, %v3022_v41, %v2884_v13 }
 0x25e   : > { %3927 = vmatmul.mubr.msk.f32.gmra.mrb[10].mxu1 %vm3060_vm13, %v3039_v29  ;;  %v2989_v23 = vsel %vm2976_vm7, %v2972_v5, %v2742_v26 }
 0x260   : > { %v2602_v55 = vpop.permute.xlu1 %2601 }
 0x261   : > { %v2556_v36 = vpop.permute.xlu0 %2555  ;;  %v2941_v34 = vsel %vm2926_vm2, %v2924_v40, %v2602_v55 }
 0x262   : > { %v2925_v59 = vsel %vm2909_vm15, %v5269_v12, %v2556_v36 }
 0x264   : > { %v2790_v9 = vpop.permute.xlu1 %2789 }
 0x265   : > { %v2744_v3 = vpop.permute.xlu0 %2743  ;;  %v3006_v62 = vsel %vm2993_vm8, %v2989_v23, %v2790_v9 }
 0x266   : > { %v2990_v22 = vsel %vm2976_vm7, %v2973_v45, %v2744_v3 }
 0x268   : > { %v2650_v58 = vpop.permute.xlu1 %2649 }
 0x269   : > { %v2604_v57 = vpop.permute.xlu0 %2603  ;;  %v2958_v61 = vsel %vm2943_vm3, %v2941_v34, %v2650_v58 }
 0x26a   : > { %v2942_v1 = vsel %vm2926_vm2, %v2925_v59, %v2604_v57 }
 0x26c   : > { %v2838_v32 = vpop.permute.xlu1 %2837 }
 0x26d   : > { %v2792_v20 = vpop.permute.xlu0 %2791  ;;  %v3023_v52 = vsel %vm3010_vm11, %v3006_v62, %v2838_v32 }
 0x26e   : > { %v3007_v63 = vsel %vm2993_vm8, %v2990_v22, %v2792_v20 }
 0x270   : > { %v2698_v4 = vpop.permute.xlu1 %2697 }
 0x271   : > { %v2652_v25 = vpop.permute.xlu0 %2651  ;;  %v2974_v51 = vsel %vm1172_vm1, %v2958_v61, %v2698_v4 }
 0x272   : > { %v2959_v50 = vsel %vm2943_vm3, %v2942_v1, %v2652_v25 }
 0x274   : > { %v2886_v24 = vpop.permute.xlu1 %2885 }
 0x275   : > { %v2840_v49 = vpop.permute.xlu0 %2839  ;;  %v3040_v37 = vsel %vm3027_vm12, %v3023_v52, %v2886_v24 }
 0x276   : > { %3929 = vmatprep.mubr.msk.f32.mxu1 %vm3060_vm13, %v3040_v37  ;;  %v3024_v7 = vsel %vm3010_vm11, %v3007_v63, %v2840_v49 }
 0x278   : > { %v2746_v10 = vpop.permute.xlu1 %2745 }
 0x279   : > { %v2700_v44 = vpop.permute.xlu0 %2699  ;;  %v2991_v16 = vsel %vm2976_vm7, %v2974_v51, %v2746_v10  ;;  %v4089_v51 = vld [vmem:[%s4366_s9 + $0x28] sm:$0x3] }
 0x27a   : > { %v2975_v35 = vsel %vm1172_vm1, %v2959_v50, %v2700_v44 }
 0x27c   : > { %v2748_v33 = vpop.permute.xlu1 %2747 }
 0x27d   : > { %v2888_v31 = vpop.permute.xlu0 %2887  ;;  %v2992_v8 = vsel %vm2976_vm7, %v2975_v35, %v2748_v33 }
 0x27e   : > { %v3041_v56 = vsel %vm3027_vm12, %v3024_v7, %v2888_v31 }
 0x27f   : > { %3930 = vmatmul.mubr.msk.f32.gmra.mrb[12].mxu1 %vm3060_vm13, %v3041_v56 }
 0x280   : > { %v2796_v54 = vpop.permute.xlu1 %2795 }
 0x281   : > { %v2794_v46 = vpop.permute.xlu0 %2793  ;;  %v3009_v12 = vsel %vm2993_vm8, %v2992_v8, %v2796_v54  ;;  %v5536_v8 = vld [vmem:[%s5698_s6] ss:$0 sm:$0xff] }
 0x282   : > { %v3008_v28 = vsel %vm2993_vm8, %v2991_v16, %v2794_v46  ;;  %v4090_v16 = vld [vmem:[%s4366_s9 + $0x18] sm:$0xff] }
 0x283   : > { %v3471_v35 = vrot.slane %v4090_v16, 1 }
 0x284   : > { %v2844_v27 = vpop.permute.xlu1 %2843 }
 0x285   : > { %v2842_v42 = vpop.permute.xlu0 %2841  ;;  %v3026_v43 = vsel %vm3010_vm11, %v3009_v12, %v2844_v27  ;;  %v3474_v27 = vrot.slane %v4089_v51, 1 }
 0x286   : > { %v3025_v30 = vsel %vm3010_vm11, %v3008_v28, %v2842_v42  ;;  %v4088_v42 = vld [vmem:[%s4366_s9 + $0x20] sm:$0xff] }
 0x287   : > { %v3472_v50 = vrot.slane %v4088_v42, 1 }
 0x288   : > { %v2892_v18 = vpop.permute.xlu1 %2891 }
 0x289   : > { %v2890_v6 = vpop.permute.xlu0 %2889  ;;  %v3043_v19 = vsel %vm3027_vm12, %v3026_v43, %v2892_v18  ;;  %v3475_v12 = vsel %vm2417_vm10, %v3472_v50, %v3474_v27  ;;  %v3473_v43 = vsel %vm2417_vm10, %v3471_v35, %v3472_v50  ;;  %v4100_v50 = vld [vmem:[%s4366_s9 + $0x80] sm:$0xff]  ;;  %v4101_v27 = vld [vmem:[%s4366_s9 + $0x88] sm:$0x3]  ;;  %v4102_v35 = vld [vmem:[%s4366_s9 + $0x78] sm:$0xff] }
 0x28a   : > { %v3042_v21 = vsel %vm3027_vm12, %v3025_v30, %v2890_v6  ;;  %v3492_v51 = vrot.slane %v4100_v50, 1  ;;  %v3494_v16 = vrot.slane %v4101_v27, 1 }
 0x28b   : > { %3932 = vmatprep.mubr.msk.f32.mxu1 %vm3060_vm13, %v3042_v21 }
 0x28c   : > { %3933 = vmatmul.mubr.msk.f32.gmra.mrb[14].mxu1 %vm3060_vm13, %v3043_v19 }
 0x291   : > { %v3913_v2 = vpop.f32.mrb[0].mxu1 }
 0x292   : > { %v3181_v14 = vadd.f32 %v3913_v2, %v3705_v38  ;;  %v3175_v47 = vpop.f32.mrb[1].mxu1 }
 0x293   : > { %v3176_v39 = vadd.f32 %v3705_v38, %v3175_v47 }
 0x294   : > { %v3255_v26 = vmax.f32 %v3181_v14, 0.0  ;;  %v4091_v14 = vld [vmem:[%s4366_s9 + $0x38] sm:$0xff] }
 0x295   : > { %v3254_v15 = vmax.f32 %v3176_v39, 0.0  ;;  %v3477_v47 = vrot.slane %v4091_v14, 1  ;;  %v4092_v39 = vld [vmem:[%s4366_s9 + $0x40] sm:$0x3] }
 0x297   : > { %3937 = vmatprep.mubr.msk.f32.mxu1 %vm2909_vm15, %v3254_v15  ;;  %v3479_v15 = vrot.slane %v4092_v39, 1 }
 0x298   : > { %3938 = vmatmul.mubr.msk.f32.vlgmr.msra.gmra.mrb[16].mxu1 %vm2909_vm15, %v3255_v26  ;;  %v4093_v26 = vld [vmem:[%s4366_s9 + $0x30] sm:$0xff] }
 0x2b1   : > { %v3916_v41 = vpop.f32.mrb[2].mxu1 }
 0x2b2   : > { %v3191_v13 = vadd.f32 %v3916_v41, %v3705_v38  ;;  %v3185_v29 = vpop.f32.mrb[3].mxu1  ;;  %v3476_v41 = vrot.slane %v4093_v26, 1 }
 0x2b3   : > { %v3186_v36 = vadd.f32 %v3705_v38, %v3185_v29  ;;  %v3480_v29 = vsel %vm2417_vm10, %v3477_v47, %v3479_v15  ;;  %v4104_v15 = vld [vmem:[%s4366_s9 + $0xa0] sm:$0x3] }
 0x2b4   : > { %v3257_v3 = vmax.f32 %v3191_v13, 0.0  ;;  %v3499_v26 = vrot.slane %v4104_v15, 1 }
 0x2b5   : > { %v3256_v55 = vmax.f32 %v3186_v36, 0.0 }
 0x2b7   : > { %3940 = vmatprep.mubr.msk.f32.mxu1 %vm2909_vm15, %v3256_v55 }
 0x2b8   : > { %3941 = vmatmul.mubr.msk.f32.gmra.mrb[18].mxu1 %vm2909_vm15, %v3257_v3  ;;  %v3478_v3 = vsel %vm2417_vm10, %v3476_v41, %v3477_v47  ;;  %v4103_v47 = vld [vmem:[%s4366_s9 + $0x98] sm:$0xff]  ;;  %v4105_v41 = vld [vmem:[%s4366_s9 + $0x90] sm:$0xff] }
 0x2b9   : > { %v3497_v39 = vrot.slane %v4103_v47, 1 }
 0x2d1   : > { %v3919_v9 = vpop.f32.mrb[4].mxu1 }
 0x2d2   : > { %v3201_v57 = vadd.f32 %v3919_v9, %v3705_v38  ;;  %v3195_v58 = vpop.f32.mrb[5].mxu1 }
 0x2d3   : > { %v3196_v20 = vadd.f32 %v3705_v38, %v3195_v58 }
 0x2d4   : > { %v3259_v17 = vmax.f32 %v3201_v57, 0.0 }
 0x2d5   : > { %v3258_v32 = vmax.f32 %v3196_v20, 0.0 }
 0x2d7   : > { %3943 = vmatprep.mubr.msk.f32.mxu1 %vm2909_vm15, %v3258_v32 }
 0x2d8   : > { %3944 = vmatmul.mubr.msk.f32.gmra.mrb[20].mxu1 %vm2909_vm15, %v3259_v17  ;;  %v4094_v17 = vld [vmem:[%s4366_s9 + $0x50] sm:$0xff] }
 0x2f1   : > { %v3922_v11 = vpop.f32.mrb[6].mxu1 }
 0x2f2   : > { %v3211_v25 = vadd.f32 %v3922_v11, %v3705_v38  ;;  %v3205_v0 = vpop.f32.mrb[7].mxu1  ;;  %v3482_v11 = vrot.slane %v4094_v17, 1 }
 0x2f3   : > { %v3206_v4 = vadd.f32 %v3705_v38, %v3205_v0 }
 0x2f4   : > { %v3261_v23 = vmax.f32 %v3211_v25, 0.0  ;;  %v4095_v25 = vld [vmem:[%s4366_s9 + $0x58] sm:$0x3] }
 0x2f5   : > { %v3260_v5 = vmax.f32 %v3206_v4, 0.0  ;;  %v3484_v0 = vrot.slane %v4095_v25, 1  ;;  %v4096_v4 = vld [vmem:[%s4366_s9 + $0x48] sm:$0xff] }
 0x2f7   : > { %3946 = vmatprep.mubr.msk.f32.mxu1 %vm2909_vm15, %v3260_v5  ;;  %v3481_v5 = vrot.slane %v4096_v4, 1 }
 0x2f8   : > { %3947 = vmatmul.mubr.msk.f32.gmra.mrb[22].mxu1 %vm2909_vm15, %v3261_v23 }
 0x311   : > { %v3925_v62 = vpop.f32.mrb[8].mxu1 }
 0x312   : > { %v3221_v49 = vadd.f32 %v3925_v62, %v3705_v38  ;;  %v3215_v52 = vpop.f32.mrb[9].mxu1  ;;  %v3485_v62 = vsel %vm2417_vm10, %v3482_v11, %v3484_v0  ;;  %v4107_v0 = vld [vmem:[%s4366_s9 + $0xb8] sm:$0x3] }
 0x313   : > { %v3216_v24 = vadd.f32 %v3705_v38, %v3215_v52  ;;  %v3504_v4 = vrot.slane %v4107_v0, 1 }
 0x314   : > { %v3263_v37 = vmax.f32 %v3221_v49, 0.0 }
 0x315   : > { %v3262_v60 = vmax.f32 %v3216_v24, 0.0  ;;  %v3483_v24 = vsel %vm2417_vm10, %v3481_v5, %v3482_v11  ;;  %v4106_v11 = vld [vmem:[%s4366_s9 + $0xb0] sm:$0xff]  ;;  %v4108_v5 = vld [vmem:[%s4366_s9 + $0xa8] sm:$0xff] }
 0x316   : > { %v3502_v25 = vrot.slane %v4106_v11, 1 }
 0x317   : > { %3949 = vmatprep.mubr.msk.f32.mxu1 %vm2909_vm15, %v3262_v60 }
 0x318   : > { %3950 = vmatmul.mubr.msk.f32.gmra.mrb[24].mxu1 %vm2909_vm15, %v3263_v37 }
 0x331   : > { %v3928_v53 = vpop.f32.mrb[10].mxu1 }
 0x332   : > { %v3231_v48 = vadd.f32 %v3928_v53, %v3705_v38  ;;  %v3225_v44 = vpop.f32.mrb[11].mxu1 }
 0x333   : > { %v3226_v45 = vadd.f32 %v3705_v38, %v3225_v44 }
 0x334   : > { %v3265_v22 = vmax.f32 %v3231_v48, 0.0 }
 0x335   : > { %v3264_v10 = vmax.f32 %v3226_v45, 0.0  ;;  %v4097_v45 = vld [vmem:[%s4366_s9 + $0x68] sm:$0xff] }
 0x337   : > { %3952 = vmatprep.mubr.msk.f32.mxu1 %vm2909_vm15, %v3264_v10  ;;  %v3487_v10 = vrot.slane %v4097_v45, 1 }
 0x338   : > { %3953 = vmatmul.mubr.msk.f32.gmra.mrb[26].mxu1 %vm2909_vm15, %v3265_v22  ;;  %v4098_v22 = vld [vmem:[%s4366_s9 + $0x70] sm:$0x3] }
 0x352   : > { %v3931_v63 = vpop.f32.mrb[12].mxu1 }
 0x353   : > { %v3241_v7 = vadd.f32 %v3931_v63, %v3705_v38  ;;  %v3235_v31 = vpop.f32.mrb[13].mxu1  ;;  %v3489_v63 = vrot.slane %v4098_v22, 1 }
 0x354   : > { %v3236_v33 = vadd.f32 %v3705_v38, %v3235_v31 }
 0x355   : > { %v3267_v46 = vmax.f32 %v3241_v7, 0.0  ;;  %v4099_v7 = vld [vmem:[%s4366_s9 + $0x60] sm:$0xff] }
 0x356   : > { %v3266_v56 = vmax.f32 %v3236_v33, 0.0  ;;  %v3486_v31 = vrot.slane %v4099_v7, 1 }
 0x358   : > { %3955 = vmatprep.mubr.msk.f32.mxu1 %vm2909_vm15, %v3266_v56  ;;  %v3490_v56 = vsel %vm2417_vm10, %v3487_v10, %v3489_v63  ;;  %v4110_v63 = vld [vmem:[%s4366_s9 + $0xd0] sm:$0x3] }
 0x359   : > { %3956 = vmatmul.mubr.msk.f32.gmra.mrb[28].mxu1 %vm2909_vm15, %v3267_v46  ;;  %v3509_v7 = vrot.slane %v4110_v63, 1 }
 0x35f   : > { %v3934_v54 = vpop.f32.mrb[14].mxu1 }
 0x360   : > { %v3251_v40 = vadd.f32 %v3934_v54, %v3705_v38  ;;  %v3245_v34 = vpop.f32.mrb[15].mxu1 }
 0x361   : > { %v3246_v59 = vadd.f32 %v3705_v38, %v3245_v34 }
 0x362   : > { %v3269_v61 = vmax.f32 %v3251_v40, 0.0  ;;  %v3488_v40 = vsel %vm2417_vm10, %v3486_v31, %v3487_v10  ;;  %v4109_v10 = vld [vmem:[%s4366_s9 + $0xc8] sm:$0xff]  ;;  %v4111_v31 = vld [vmem:[%s4366_s9 + $0xc0] sm:$0xff]  ;;  %s3743_s9 = sshll.u32 %s3589_s22, 7  ;;  %s4124_s22 = sshll.u32 %s4228_s13, 4  ;;  %s4125_s22 = int_to_ptr.vmem [resolvable:$false] %s4124_s22 }
 0x363   : > { %v3268_v1 = vmax.f32 %v3246_v59, 0.0  ;;  %v3507_v22 = vrot.slane %v4109_v10, 1  ;;  %s5631_s21 = scalar_lea.hbm %s5699_s7, %s3743_s9  ;;  %s4126_s0 = scalar_lea.vmem %s4125_s22, 4096 }
 0x364   : > { %p4127_p2 = scmp.lt.s32.totalorder %s5626_s18, %s4125_s22  ;;  %p4128_p4 = scmp.lt.s32.totalorder %s4126_s0, %s4120_s23 }
 0x365   : > { %3958 = vmatprep.mubr.msk.f32.mxu1 %vm2909_vm15, %v3268_v1 }
 0x366   : > { %3959 = vmatmul.mubr.msk.f32.gmra.mrb[30].mxu1 %vm2909_vm15, %v3269_v61  ;;  %p4129_p5 = por %p4128_p4, %p4127_p2 }
 0x368   : > { %p4130_p6 = pnand %p4129_p5, %p4123_p1 }
 0x36b   : > { %v3939_v28 = vpop.f32.mrb[16].mxu1 }
 0x36c   : > { %v3398_v30 = vadd.f32 %v3939_v28, %v5536_v8  ;;  %v3392_v6 = vpop.f32.mrb[17].mxu1  ;;  %v3491_v28 = vrot.slane %v4102_v35, 1 }
 0x36d   : > { %v3393_v21 = vadd.f32 %v5536_v8, %v3392_v6 }
 0x36e   : > { %v3528_v18 = vadd.f32 %v3475_v12, %v3398_v30  ;;  %v3495_v30 = vsel %vm2417_vm10, %v3492_v51, %v3494_v16 }
 0x36f   : > { %v3527_v19 = vadd.f32 %v3473_v43, %v3393_v21  ;;  %v3493_v21 = vsel %vm2417_vm10, %v3491_v28, %v3492_v51 }
 0x370   : > { %v3544_v38 = vmax.f32 %v3528_v18, 0.0 }
 0x371   : > { %v3543_v2 = vmax.f32 %v3527_v19, 0.0 }
 0x372   : > { %3560 = vst.msk [vmem:[%s5544_s20 + $0x8] sm:$0xff] %vm1172_vm1, %v3544_v38 }
 0x373   : > { %3559 = vst.msk [vmem:[%s5544_s20] sm:$0xff] %vm1172_vm1, %v3543_v2 }
 0x38b   : > { %v3942_v13 = vpop.f32.mrb[18].mxu1 }
 0x38c   : > { %v3408_v36 = vadd.f32 %v3942_v13, %v5536_v8  ;;  %v3402_v55 = vpop.f32.mrb[19].mxu1  ;;  %v3496_v13 = vrot.slane %v4105_v41, 1 }
 0x38d   : > { %v3403_v9 = vadd.f32 %v5536_v8, %v3402_v55 }
 0x38e   : > { %v3530_v57 = vadd.f32 %v3480_v29, %v3408_v36  ;;  %v3500_v36 = vsel %vm2417_vm10, %v3497_v39, %v3499_v26 }
 0x38f   : > { %v3529_v58 = vadd.f32 %v3478_v3, %v3403_v9  ;;  %v3498_v9 = vsel %vm2417_vm10, %v3496_v13, %v3497_v39 }
 0x390   : > { %v3546_v20 = vmax.f32 %v3530_v57, 0.0 }
 0x391   : > { %v3545_v32 = vmax.f32 %v3529_v58, 0.0 }
 0x392   : > { %3562 = vst.msk [vmem:[%s5544_s20 + $0x18] sm:$0xff] %vm1172_vm1, %v3546_v20 }
 0x393   : > { %3561 = vst.msk [vmem:[%s5544_s20 + $0x10] sm:$0xff] %vm1172_vm1, %v3545_v32 }
 0x3ab   : > { %v3945_v23 = vpop.f32.mrb[20].mxu1 }
 0x3ac   : > { %v3418_v49 = vadd.f32 %v3945_v23, %v5536_v8  ;;  %v3412_v52 = vpop.f32.mrb[21].mxu1  ;;  %v3501_v23 = vrot.slane %v4108_v5, 1 }
 0x3ad   : > { %v3413_v60 = vadd.f32 %v5536_v8, %v3412_v52 }
 0x3ae   : > { %v3532_v37 = vadd.f32 %v3485_v62, %v3418_v49  ;;  %v3505_v49 = vsel %vm2417_vm10, %v3502_v25, %v3504_v4 }
 0x3af   : > { %v3531_v53 = vadd.f32 %v3483_v24, %v3413_v60  ;;  %v3503_v60 = vsel %vm2417_vm10, %v3501_v23, %v3502_v25 }
 0x3b0   : > { %v3548_v48 = vmax.f32 %v3532_v37, 0.0 }
 0x3b1   : > { %v3547_v44 = vmax.f32 %v3531_v53, 0.0 }
 0x3b2   : > { %3564 = vst.msk [vmem:[%s5544_s20 + $0x28] sm:$0xff] %vm1172_vm1, %v3548_v48 }
 0x3b3   : > { %3563 = vst.msk [vmem:[%s5544_s20 + $0x20] sm:$0xff] %vm1172_vm1, %v3547_v44 }
 0x3cb   : > { %v3948_v33 = vpop.f32.mrb[22].mxu1 }
 0x3cc   : > { %v3428_v46 = vadd.f32 %v3948_v33, %v5536_v8  ;;  %v3422_v54 = vpop.f32.mrb[23].mxu1  ;;  %v3506_v33 = vrot.slane %v4111_v31, 1 }
 0x3cd   : > { %v3423_v34 = vadd.f32 %v5536_v8, %v3422_v54 }
 0x3ce   : > { %v3534_v59 = vadd.f32 %v3490_v56, %v3428_v46  ;;  %v3510_v46 = vsel %vm2417_vm10, %v3507_v22, %v3509_v7 }
 0x3cf   : > { %v3533_v1 = vadd.f32 %v3488_v40, %v3423_v34  ;;  %v3508_v34 = vsel %vm2417_vm10, %v3506_v33, %v3507_v22 }
 0x3d0   : > { %v3550_v61 = vmax.f32 %v3534_v59, 0.0 }
 0x3d1   : > { %v3549_v42 = vmax.f32 %v3533_v1, 0.0 }
 0x3d2   : > { %3566 = vst.msk [vmem:[%s5544_s20 + $0x38] sm:$0xff] %vm1172_vm1, %v3550_v61 }
 0x3d3   : > { %3565 = vst.msk [vmem:[%s5544_s20 + $0x30] sm:$0xff] %vm1172_vm1, %v3549_v42 }
 0x3eb   : > { %v3951_v12 = vpop.f32.mrb[24].mxu1 }
 0x3ec   : > { %v3438_v6 = vadd.f32 %v3951_v12, %v5536_v8  ;;  %v3432_v43 = vpop.f32.mrb[25].mxu1 }
 0x3ed   : > { %v3433_v18 = vadd.f32 %v5536_v8, %v3432_v43 }
 0x3ee   : > { %v3536_v19 = vadd.f32 %v3495_v30, %v3438_v6 }
 0x3ef   : > { %v3535_v38 = vadd.f32 %v3493_v21, %v3433_v18 }
 0x3f0   : > { %v3552_v2 = vmax.f32 %v3536_v19, 0.0 }
 0x3f1   : > { %v3551_v14 = vmax.f32 %v3535_v38, 0.0 }
 0x3f2   : > { %3568 = vst.msk [vmem:[%s5544_s20 + $0x48] sm:$0xff] %vm1172_vm1, %v3552_v2 }
 0x3f3   : > { %3567 = vst.msk [vmem:[%s5544_s20 + $0x40] sm:$0xff] %vm1172_vm1, %v3551_v14 }
 0x40b   : > { %v3954_v29 = vpop.f32.mrb[26].mxu1 }
 0x40c   : > { %v3448_v55 = vadd.f32 %v3954_v29, %v5536_v8  ;;  %v3442_v3 = vpop.f32.mrb[27].mxu1 }
 0x40d   : > { %v3443_v57 = vadd.f32 %v5536_v8, %v3442_v3 }
 0x40e   : > { %v3538_v58 = vadd.f32 %v3500_v36, %v3448_v55 }
 0x40f   : > { %v3537_v20 = vadd.f32 %v3498_v9, %v3443_v57 }
 0x410   : > { %v3554_v32 = vmax.f32 %v3538_v58, 0.0 }
 0x411   : > { %v3553_v17 = vmax.f32 %v3537_v20, 0.0 }
 0x412   : > { %3570 = vst.msk [vmem:[%s5544_s20 + $0x58] sm:$0xff] %vm1172_vm1, %v3554_v32 }
 0x413   : > { %3569 = vst.msk [vmem:[%s5544_s20 + $0x50] sm:$0xff] %vm1172_vm1, %v3553_v17 }
 0x42c   : > { %v3957_v62 = vpop.f32.mrb[28].mxu1 }
 0x42d   : > { %v3458_v52 = vadd.f32 %v3957_v62, %v5536_v8  ;;  %v3452_v24 = vpop.f32.mrb[29].mxu1 }
 0x42e   : > { %v3453_v37 = vadd.f32 %v5536_v8, %v3452_v24 }
 0x42f   : > { %v3540_v53 = vadd.f32 %v3505_v49, %v3458_v52 }
 0x430   : > { %v3539_v48 = vadd.f32 %v3503_v60, %v3453_v37 }
 0x431   : > { %v3556_v44 = vmax.f32 %v3540_v53, 0.0 }
 0x432   : > { %v3555_v45 = vmax.f32 %v3539_v48, 0.0 }
 0x433   : > { %3572 = vst.msk [vmem:[%s5544_s20 + $0x68] sm:$0xff] %vm1172_vm1, %v3556_v44 }
 0x434   : > { %3571 = vst.msk [vmem:[%s5544_s20 + $0x60] sm:$0xff] %vm1172_vm1, %v3555_v45 }
 0x439   : > { %v3960_v56 = vpop.f32.mrb[30].mxu1 }
 0x43a   : > { %v3468_v54 = vadd.f32 %v3960_v56, %v5536_v8  ;;  %v3462_v40 = vpop.f32.mrb[31].mxu1 }
 0x43b   : > { %v3463_v59 = vadd.f32 %v5536_v8, %v3462_v40 }
 0x43c   : > { %v3542_v1 = vadd.f32 %v3510_v46, %v3468_v54 }
 0x43d   : > { %v3541_v61 = vadd.f32 %v3508_v34, %v3463_v59 }
 0x43e   : > { %v3558_v42 = vmax.f32 %v3542_v1, 0.0 }
 0x43f   : > { %v3557_v50 = vmax.f32 %v3541_v61, 0.0 }
 0x440   : > { %3574 = vst.msk [vmem:[%s5544_s20 + $0x78] sm:$0xff] %vm1172_vm1, %v3558_v42 }
 0x441   : > { %3573 = vst.msk [vmem:[%s5544_s20 + $0x70] sm:$0xff] %vm1172_vm1, %v3557_v50 }
 0x442   : > { %4133 = shalt.err (!%p4130_p6)
}
 0x443   : > { %s4134_s16 = scalar_lea.hbm %s5631_s21, 2048  ;;  %s4138_s27 = scalar_lea.hbm %s5699_s7, 8192 }
 0x444   : > { %p4135_p7 = scmp.ne.s32.totalorder %s5631_s21, %s4134_s16  ;;  %p4139_p11 = scmp.lt.u32.totalorder %s5631_s21, %s5699_s7 }
 0x445   : > { %p4140_p12 = scmp.lt.u32.totalorder %s4138_s27, %s4134_s16  ;;  %p4142_p0 = scmp.lt.u32.totalorder %s4134_s16, %s5631_s21 }
 0x446   : > { %p4136_p9 = pnand %p4135_p7, %p4321_p3 }
 0x447   : > { %p4141_p13 = por %p4140_p12, %p4139_p11 }
 0x448   : > { %p4137_p10 = pneg %p4136_p9 }
 0x449   : > { %p4143_p1 = por %p4142_p0, %p4141_p13 }
 0x44b   : > { %p4144_p2 = pnand %p4143_p1, %p4137_p10 }
 0x44d   : > { %4147 = shalt.err (!%p4144_p2)
}
 0x44e   : > { %s4229_s0 = smov 128  }
 0x44f   : > { %3984 = dma.vmem_to_hbm [thread:$0]  (%p4321_p3), %s5626_s18, 2048, %s5631_s21, %s5639_s17, %s4229_s0, %s4229_s0, %s5735_s10  }
 0x450 PF: > { %p3990_p4 = scmp.ge.s32.totalorder %s4214_s8, 2  ;;  %s3607_s23 = sand.u32 1, %s4186_s24  }
 0x451   : > { %s3608_s22 = scalar_lea.sflag [#allocation3], %s3607_s23 }
 0x452   : > { %p3987_p5 = pnand %p3990_p4, %p4330_p8 }
 0x454   : > { %4181 = dma.done.wait (!%p3987_p5), %s3608_s22, 2048  }
 0x455   : > { %4183 = vsyncadd (!%p3987_p5), %s3608_s22, 4294965248  ;;  %s20_s8 = sadd.s32 1, %s4214_s8   ;;  %s5754_s24 = smov %s4190_s25 }
 0x456   : > { %p17_p6 = scmp.ge.s32.totalorder %s20_s8, 6   ;;  %s5755_s25 = smov %s4194_s26 }
 0x457   : > { %s5756_s26 = smov %s4339_s19  ;;  %s5757_s27 = smov %s4206_s29 }
 0x458   : > { %s5758_s28 = smov %s4210_s30  ;;  %s5759_s29 = smov %s5762_s11 }
 0x459   : > { %s5760_s30 = smov %s5766_s12  ;;  %19 = sbr.rel (!%p17_p6) target bundleno = 7 (0x7), region = 84 }
 0x460   :  { %3613 = vsyncpa [#allocation3], 1 }
 0x461   :  { %3615 = vsyncpa [#allocation3 + $0x1], 1 }

</bundles_post_ra>
